<compile_context>
chip_gen: v7x
topology: tpu7x:2x2x1
jax: 0.10.0
libtpu: 0.0.40
codegen_flags: <defaults>
</compile_context>

<pallas_src>
import functools

import numpy as np
import jax
import jax.numpy as jnp
from jax.experimental import pallas as pl
from jax.experimental.pallas import tpu as pltpu


def _flow_head_kernel(x_ref, w1_ref, b1_ref, w2_ref, b2_ref, mask_ref, o_ref,
                      *, H, W, Wp):
    """One batch element per grid step; everything channel-major.

    x_ref:    (1, Cin,  Hp*Wp + 2)  bf16  padded input, spatially flattened
    w1_ref:   (Chid, 9*Cin)         bf16  conv1 weights (transposed im2col layout)
    b1_ref:   (Chid, 1)             f32
    w2_ref:   (Cout, 9*Chid)        bf16  conv2 weights (transposed im2col layout)
    b2_ref:   (Cout, 1)             f32
    mask_ref: (1, H*Wp)             f32   1.0 on real columns, 0.0 on junk columns
    o_ref:    (1, Cout, H*Wp)       f32   flattened-NCHW output (junk cols included)
    """
    lout = H * Wp
    offs = tuple(dy * Wp + dx for dy in range(3) for dx in range(3))

    x = x_ref[0]                                        # (Cin, Lx) bf16

    # ---- conv1: one (Chid, 9*Cin) @ (9*Cin, lout) MXU matmul ---------------
    p1 = jnp.concatenate([x[:, o:o + lout] for o in offs], axis=0)
    h = jnp.dot(w1_ref[...], p1, preferred_element_type=jnp.float32)
    h = jnp.maximum(h + b1_ref[...], 0.0)               # bias + fused ReLU (f32)
    h = h * mask_ref[...]                               # zero junk cols -> conv2 zero padding
    h = h.astype(jnp.bfloat16)

    # ---- re-pad the hidden activation in flattened form (stays on-chip) ----
    chid = h.shape[0]
    zpad = jnp.zeros((chid, Wp + 1), jnp.bfloat16)
    h_pad = jnp.concatenate([zpad, h, zpad], axis=1)    # (Chid, lout + 2*Wp + 2)

    # ---- conv2: one (Cout, 9*Chid) @ (9*Chid, lout) MXU matmul -------------
    p2 = jnp.concatenate([h_pad[:, o:o + lout] for o in offs], axis=0)
    out = jnp.dot(w2_ref[...], p2, preferred_element_type=jnp.float32)
    out = out + b2_ref[...]                             # (Cout, lout), lane-dense

    o_ref[0] = out.astype(o_ref.dtype)


def flow_head_forward(params, x_nchw):
    """Equivalent of FlowHead.forward: conv2(relu(conv1(x))). NCHW in / NCHW out."""
    N, Cin, H, W = x_nchw.shape
    Hp, Wp = H + 2, W + 2
    Chid = params["w1"].shape[-1]
    Cout = params["w2"].shape[-1]
    lout = H * Wp
    lx = Hp * Wp + 2      # +2 slack rows so the dy=2,dx=2 shifted slice stays in range

    # Pad spatially, flatten spatial dims, add slack, cast to bf16 once.
    # No NCHW<->NHWC transpose anywhere on the activation path.
    x = jnp.pad(x_nchw, ((0, 0), (0, 0), (1, 1), (1, 1)))
    x = x.reshape(N, Cin, Hp * Wp)
    x = jnp.pad(x, ((0, 0), (0, 0), (0, 2))).astype(jnp.bfloat16)

    # Weights: HWIO -> lane-dense (Cout, 9*Cin) transposed-im2col layout, bf16.
    w1t = params["w1"].reshape(9 * Cin, Chid).T.astype(jnp.bfloat16)
    w2t = params["w2"].reshape(9 * Chid, Cout).T.astype(jnp.bfloat16)
    b1 = params["b1"].reshape(Chid, 1).astype(jnp.float32)
    b2 = params["b2"].reshape(Cout, 1).astype(jnp.float32)

    # 1.0 on real output columns (x < W), 0.0 on the 2 junk columns per padded row.
    mask = jnp.asarray((np.arange(lout) % Wp < W).astype(np.float32)).reshape(1, lout)

    kernel = functools.partial(_flow_head_kernel, H=H, W=W, Wp=Wp)

    out = pl.pallas_call(
        kernel,
        out_shape=jax.ShapeDtypeStruct((N, Cout, lout), jnp.float32),
        grid=(N,),
        in_specs=[
            pl.BlockSpec((1, Cin, lx), lambda n: (n, 0, 0)),
            pl.BlockSpec((Chid, 9 * Cin), lambda n: (0, 0)),
            pl.BlockSpec((Chid, 1), lambda n: (0, 0)),
            pl.BlockSpec((Cout, 9 * Chid), lambda n: (0, 0)),
            pl.BlockSpec((Cout, 1), lambda n: (0, 0)),
            pl.BlockSpec((1, lout), lambda n: (0, 0)),
        ],
        out_specs=pl.BlockSpec((1, Cout, lout), lambda n: (n, 0, 0)),
        compiler_params=pltpu.CompilerParams(
            dimension_semantics=("parallel",)),
        # NOTE: at RAFT-scale feature maps / hidden=256 this whole-image block
        # should be re-tiled along H (2-row halo, second parallel grid axis for
        # v7x's 2 TCs) with vmem_limit_bytes set; at this size it fits easily.
    )(x, w1t, b1, w2t, b2, mask)

    # (N, Cout, H*Wp) is flattened NCHW with 2 junk columns per row: drop them.
    return out.reshape(N, Cout, H, Wp)[:, :, :, :W]


def init_flow_head_params(key, input_dim, hidden_dim, out_dim,
                          dtype=jnp.float32):
    """Deterministic synthetic parameters (HWIO; matches nn.Conv2d(.,.,3,padding=1) shapes)."""
    k1, k2, k3, k4 = jax.random.split(key, 4)
    w1 = jax.random.normal(k1, (3, 3, input_dim, hidden_dim), dtype) * 0.05
    b1 = jax.random.normal(k2, (hidden_dim,), dtype) * 0.05
    w2 = jax.random.normal(k3, (3, 3, hidden_dim, out_dim), dtype) * 0.05
    b2 = jax.random.normal(k4, (out_dim,), dtype) * 0.05
    return {"w1": w1, "b1": b1, "w2": w2, "b2": b2}


def _reference_forward(params, x_nchw):
    """lax.conv reference mirroring the kernel's bf16-operand / f32-accum math."""
    dn = ("NCHW", "HWIO", "NCHW")
    h = jax.lax.conv_general_dilated(
        x_nchw.astype(jnp.bfloat16), params["w1"].astype(jnp.bfloat16),
        (1, 1), "SAME", dimension_numbers=dn,
        preferred_element_type=jnp.float32)
    h = jnp.maximum(h + params["b1"][None, :, None, None], 0.0)
    y = jax.lax.conv_general_dilated(
        h.astype(jnp.bfloat16), params["w2"].astype(jnp.bfloat16),
        (1, 1), "SAME", dimension_numbers=dn,
        preferred_element_type=jnp.float32)
    return y + params["b2"][None, :, None, None]


if __name__ == "__main__":
    # Small shapes consistent with FlowHead(input_dim, out_dim=2, hidden_dim).
    N, C_IN, HID, C_OUT, H, W = 2, 32, 64, 2, 16, 16

    key = jax.random.PRNGKey(0)
    k_x, k_p = jax.random.split(key)
    x = jax.random.normal(k_x, (N, C_IN, H, W), jnp.float32)
    params = init_flow_head_params(k_p, C_IN, HID, C_OUT)

    out = jax.block_until_ready(flow_head_forward(params, x))
    assert out.shape == (N, C_OUT, H, W), out.shape

    ref = jax.block_until_ready(_reference_forward(params, x))
    assert jnp.allclose(out, ref, atol=2e-2, rtol=2e-2), (
        "mismatch vs lax.conv reference, max abs err = %f"
        % float(jnp.max(jnp.abs(out - ref))))

    print("KERNEL_OK")
</pallas_src>

<mosaic_0001>
module attributes {stable_mosaic.version = 11 : i64} {
  func.func @_flow_head_kernel(%arg0: i32, %arg1: memref<1x32x326xbf16, #tpu.memory_space<vmem>>, %arg2: memref<64x288xbf16, #tpu.memory_space<vmem>>, %arg3: memref<64x1xf32, #tpu.memory_space<vmem>>, %arg4: memref<2x576xbf16, #tpu.memory_space<vmem>>, %arg5: memref<2x1xf32, #tpu.memory_space<vmem>>, %arg6: memref<1x288xf32, #tpu.memory_space<vmem>>, %arg7: memref<1x2x288xf32, #tpu.memory_space<vmem>>) attributes {dimension_semantics = [#tpu.dimension_semantics<parallel>], iteration_bounds = array<i64: 2>, scalar_prefetch = 0 : i64, scratch_operands = 0 : i64, tpu.core_type = #tpu.core_type<tc>, window_params = [{transform_indices = @transform_0, window_bounds = array<i64: 1, 32, 326>}, {pipeline_mode = #tpu.pipeline_mode<synchronous>, transform_indices = @transform_1, window_bounds = array<i64: 64, 288>}, {pipeline_mode = #tpu.pipeline_mode<synchronous>, transform_indices = @transform_2, window_bounds = array<i64: 64, 1>}, {pipeline_mode = #tpu.pipeline_mode<synchronous>, transform_indices = @transform_3, window_bounds = array<i64: 2, 576>}, {pipeline_mode = #tpu.pipeline_mode<synchronous>, transform_indices = @transform_4, window_bounds = array<i64: 2, 1>}, {pipeline_mode = #tpu.pipeline_mode<synchronous>, transform_indices = @transform_5, window_bounds = array<i64: 1, 288>}, {transform_indices = @transform_6, window_bounds = array<i64: 1, 2, 288>}]} {
    %c0 = arith.constant 0 : index
    %c0_0 = arith.constant 0 : index
    %c0_1 = arith.constant 0 : index
    %0 = vector.load %arg1[%c0, %c0_0, %c0_1] : memref<1x32x326xbf16, #tpu.memory_space<vmem>>, vector<1x32x326xbf16>
    %1 = vector.shape_cast %0 : vector<1x32x326xbf16> to vector<32x326xbf16>
    %2 = vector.extract_strided_slice %1 {offsets = [0, 0], sizes = [32, 288], strides = [1, 1]} : vector<32x326xbf16> to vector<32x288xbf16>
    %3 = vector.extract_strided_slice %1 {offsets = [0, 1], sizes = [32, 288], strides = [1, 1]} : vector<32x326xbf16> to vector<32x288xbf16>
    %4 = vector.extract_strided_slice %1 {offsets = [0, 2], sizes = [32, 288], strides = [1, 1]} : vector<32x326xbf16> to vector<32x288xbf16>
    %5 = vector.extract_strided_slice %1 {offsets = [0, 18], sizes = [32, 288], strides = [1, 1]} : vector<32x326xbf16> to vector<32x288xbf16>
    %6 = vector.extract_strided_slice %1 {offsets = [0, 19], sizes = [32, 288], strides = [1, 1]} : vector<32x326xbf16> to vector<32x288xbf16>
    %7 = vector.extract_strided_slice %1 {offsets = [0, 20], sizes = [32, 288], strides = [1, 1]} : vector<32x326xbf16> to vector<32x288xbf16>
    %8 = vector.extract_strided_slice %1 {offsets = [0, 36], sizes = [32, 288], strides = [1, 1]} : vector<32x326xbf16> to vector<32x288xbf16>
    %9 = vector.extract_strided_slice %1 {offsets = [0, 37], sizes = [32, 288], strides = [1, 1]} : vector<32x326xbf16> to vector<32x288xbf16>
    %10 = vector.extract_strided_slice %1 {offsets = [0, 38], sizes = [32, 288], strides = [1, 1]} : vector<32x326xbf16> to vector<32x288xbf16>
    %11 = tpu.concatenate %2, %3, %4, %5, %6, %7, %8, %9, %10 in 0 : vector<32x288xbf16>, vector<32x288xbf16>, vector<32x288xbf16>, vector<32x288xbf16>, vector<32x288xbf16>, vector<32x288xbf16>, vector<32x288xbf16>, vector<32x288xbf16>, vector<32x288xbf16> -> vector<288x288xbf16>
    %c0_2 = arith.constant 0 : index
    %c0_3 = arith.constant 0 : index
    %12 = vector.load %arg2[%c0_2, %c0_3] : memref<64x288xbf16, #tpu.memory_space<vmem>>, vector<64x288xbf16>
    %cst = arith.constant dense<0.000000e+00> : vector<64x288xf32>
    %13 = tpu.matmul %12, %11, %cst {dimension_numbers = #tpu.dot_dimension_numbers<[1], [0], [0], [1], [0, 0, 1, 1], [], []>} : vector<64x288xbf16>, vector<288x288xbf16>, vector<64x288xf32> -> vector<64x288xf32>
    %c0_4 = arith.constant 0 : index
    %c0_5 = arith.constant 0 : index
    %14 = vector.load %arg3[%c0_4, %c0_5] : memref<64x1xf32, #tpu.memory_space<vmem>>, vector<64x1xf32>
    %15 = vector.broadcast %14 : vector<64x1xf32> to vector<64x288xf32>
    %16 = arith.addf %13, %15 : vector<64x288xf32>
    %cst_6 = arith.constant 0.000000e+00 : f32
    %17 = vector.broadcast %cst_6 : f32 to vector<64x288xf32>
    %18 = arith.maximumf %16, %17 : vector<64x288xf32>
    %c0_7 = arith.constant 0 : index
    %c0_8 = arith.constant 0 : index
    %19 = vector.load %arg6[%c0_7, %c0_8] : memref<1x288xf32, #tpu.memory_space<vmem>>, vector<1x288xf32>
    %20 = vector.broadcast %19 : vector<1x288xf32> to vector<64x288xf32>
    %21 = arith.mulf %18, %20 : vector<64x288xf32>
    %22 = arith.truncf %21 : vector<64x288xf32> to vector<64x288xbf16>
    %cst_9 = arith.constant 0.000000e+00 : bf16
    %23 = vector.broadcast %cst_9 : bf16 to vector<64x19xbf16>
    %24 = tpu.concatenate %23, %22, %23 in 1 : vector<64x19xbf16>, vector<64x288xbf16>, vector<64x19xbf16> -> vector<64x326xbf16>
    %25 = vector.extract_strided_slice %24 {offsets = [0, 0], sizes = [64, 288], strides = [1, 1]} : vector<64x326xbf16> to vector<64x288xbf16>
    %26 = vector.extract_strided_slice %24 {offsets = [0, 1], sizes = [64, 288], strides = [1, 1]} : vector<64x326xbf16> to vector<64x288xbf16>
    %27 = vector.extract_strided_slice %24 {offsets = [0, 2], sizes = [64, 288], strides = [1, 1]} : vector<64x326xbf16> to vector<64x288xbf16>
    %28 = vector.extract_strided_slice %24 {offsets = [0, 18], sizes = [64, 288], strides = [1, 1]} : vector<64x326xbf16> to vector<64x288xbf16>
    %29 = vector.extract_strided_slice %24 {offsets = [0, 19], sizes = [64, 288], strides = [1, 1]} : vector<64x326xbf16> to vector<64x288xbf16>
    %30 = vector.extract_strided_slice %24 {offsets = [0, 20], sizes = [64, 288], strides = [1, 1]} : vector<64x326xbf16> to vector<64x288xbf16>
    %31 = vector.extract_strided_slice %24 {offsets = [0, 36], sizes = [64, 288], strides = [1, 1]} : vector<64x326xbf16> to vector<64x288xbf16>
    %32 = vector.extract_strided_slice %24 {offsets = [0, 37], sizes = [64, 288], strides = [1, 1]} : vector<64x326xbf16> to vector<64x288xbf16>
    %33 = vector.extract_strided_slice %24 {offsets = [0, 38], sizes = [64, 288], strides = [1, 1]} : vector<64x326xbf16> to vector<64x288xbf16>
    %34 = tpu.concatenate %25, %26, %27, %28, %29, %30, %31, %32, %33 in 0 : vector<64x288xbf16>, vector<64x288xbf16>, vector<64x288xbf16>, vector<64x288xbf16>, vector<64x288xbf16>, vector<64x288xbf16>, vector<64x288xbf16>, vector<64x288xbf16>, vector<64x288xbf16> -> vector<576x288xbf16>
    %c0_10 = arith.constant 0 : index
    %c0_11 = arith.constant 0 : index
    %35 = vector.load %arg4[%c0_10, %c0_11] : memref<2x576xbf16, #tpu.memory_space<vmem>>, vector<2x576xbf16>
    %cst_12 = arith.constant dense<0.000000e+00> : vector<2x288xf32>
    %36 = tpu.matmul %35, %34, %cst_12 {dimension_numbers = #tpu.dot_dimension_numbers<[1], [0], [0], [1], [0, 0, 1, 1], [], []>} : vector<2x576xbf16>, vector<576x288xbf16>, vector<2x288xf32> -> vector<2x288xf32>
    %c0_13 = arith.constant 0 : index
    %c0_14 = arith.constant 0 : index
    %37 = vector.load %arg5[%c0_13, %c0_14] : memref<2x1xf32, #tpu.memory_space<vmem>>, vector<2x1xf32>
    %38 = vector.broadcast %37 : vector<2x1xf32> to vector<2x288xf32>
    %39 = arith.addf %36, %38 : vector<2x288xf32>
    %c0_15 = arith.constant 0 : index
    %c0_16 = arith.constant 0 : index
    %c0_17 = arith.constant 0 : index
    %40 = vector.load %arg7[%c0_15, %c0_16, %c0_17] : memref<1x2x288xf32, #tpu.memory_space<vmem>>, vector<1x2x288xf32>
    %41 = vector.shape_cast %40 : vector<1x2x288xf32> to vector<2x288xf32>
    %42 = vector.shape_cast %39 : vector<2x288xf32> to vector<1x2x288xf32>
    tpu.vector_store %arg7[%c0_15, %c0_16, %c0_17], %42 {strides = array<i32>} : memref<1x2x288xf32, #tpu.memory_space<vmem>>, vector<1x2x288xf32>,
    return
  }
  func.func @transform_0(%arg0: i32) -> (i32, i32, i32) {
    %c0_i32 = arith.constant 0 : i32
    %c0_i32_0 = arith.constant 0 : i32
    %c0_i32_1 = arith.constant 0 : i32
    return %arg0, %c0_i32, %c0_i32_0 : i32, i32, i32
  }
  func.func @transform_1(%arg0: i32) -> (i32, i32) {
    %c0_i32 = arith.constant 0 : i32
    %c0_i32_0 = arith.constant 0 : i32
    %c0_i32_1 = arith.constant 0 : i32
    return %c0_i32, %c0_i32_0 : i32, i32
  }
  func.func @transform_2(%arg0: i32) -> (i32, i32) {
    %c0_i32 = arith.constant 0 : i32
    %c0_i32_0 = arith.constant 0 : i32
    %c0_i32_1 = arith.constant 0 : i32
    return %c0_i32, %c0_i32_0 : i32, i32
  }
  func.func @transform_3(%arg0: i32) -> (i32, i32) {
    %c0_i32 = arith.constant 0 : i32
    %c0_i32_0 = arith.constant 0 : i32
    %c0_i32_1 = arith.constant 0 : i32
    return %c0_i32, %c0_i32_0 : i32, i32
  }
  func.func @transform_4(%arg0: i32) -> (i32, i32) {
    %c0_i32 = arith.constant 0 : i32
    %c0_i32_0 = arith.constant 0 : i32
    %c0_i32_1 = arith.constant 0 : i32
    return %c0_i32, %c0_i32_0 : i32, i32
  }
  func.func @transform_5(%arg0: i32) -> (i32, i32) {
    %c0_i32 = arith.constant 0 : i32
    %c0_i32_0 = arith.constant 0 : i32
    %c0_i32_1 = arith.constant 0 : i32
    return %c0_i32, %c0_i32_0 : i32, i32
  }
  func.func @transform_6(%arg0: i32) -> (i32, i32, i32) {
    %c0_i32 = arith.constant 0 : i32
    %c0_i32_0 = arith.constant 0 : i32
    %c0_i32_1 = arith.constant 0 : i32
    return %arg0, %c0_i32, %c0_i32_0 : i32, i32, i32
  }
}

</mosaic_0001>

<bundles_post_ra>
// kernel: tpu_custom_call.1
= control target key start
LH: loop header
LB: loop body
LE: loop exit
PB: predicated region body
PF: predicated region fallthrough
CT: control target
= control target key end

     0   :  { %11 = vsyncpa [#allocation3], 0  ;;  %s3308_s0 = inlined_call_operand.hbm [shape: bf16[2,32,326], index: 0, kind: input, shape index: {}]   ;;  %s3309_s1 = inlined_call_operand.hbm [shape: bf16[64,288], index: 1, kind: input, shape index: {}]   ;;  %s3310_s2 = inlined_call_operand.vmem [shape: f32[64,1], index: 2, kind: input, shape index: {}]   ;;  %s3311_s3 = inlined_call_operand.vmem [shape: bf16[2,576], index: 3, kind: input, shape index: {}]   ;;  %s3312_s4 = inlined_call_operand.vmem [shape: f32[2,1], index: 4, kind: input, shape index: {}]   ;;  %s3313_s5 = inlined_call_operand.vmem [shape: f32[1,288], index: 5, kind: input, shape index: {}]   ;;  %s3314_s6 = inlined_call_operand.hbm [shape: f32[2,2,288], index: 6, kind: output, shape index: {}]  }
   0x1   :  { %13 = vsyncpa [#allocation3 + $0x1], 0 }
   0x2   :  { %14 = vsyncpa [#allocation6], 0 }
   0x3   :  { %15 = vsyncpa [#allocation4], 0 }
   0x4   :  { %17 = vsyncpa [#allocation4 + $0x1], 0  ;;  %s2351_s21 = smov 0   ;;  %s2353_s22 = smov 0  }
   0x5   :  { %s2355_s23 = smov 0   ;;  %s2357_s24 = smov 0  }
   0x6 LB: > { %s2372_s25 = sadd.s32 4294967295, %s2295_s24   ;;  %s1855_s26 = sadd.s32 4294967294, %s2295_s24   ;;  %s2295_s24 = sphi %s2357_s24, %s3346_s24   ;;  %s2291_s23 = sphi %s2355_s23, %s3345_s23   ;;  %s2287_s22 = sphi %s2353_s22, %s3344_s22   ;;  %s2283_s21 = sphi %s2351_s21, %s3343_s21  }
   0x7   : > { %p43_p0 = scmp.ne.s32.totalorder %s2287_s22, %s2283_s21  ;;  %p3315_p1 = scmp.eq.s32.totalorder %s2372_s25, 0 }
   0x8   : > { %p178_p3 = scmp.eq.s32.totalorder %s1855_s26, 1  ;;  %p1856_p5 = scmp.ge.s32.totalorder %s2295_s24, 1 }
   0x9   : > { %p2381_p4 = por %p3315_p1, %p43_p0  ;;  %p185_p7 = scmp.lt.s32.totalorder %s2295_s24, 3 }
   0xa   : > { %p2386_p6 = por %p178_p3, %p43_p0  ;;  %s2297_s30 = smov [#allocation5]  }
   0xb   : > { %s3324_s27 = scalar_select %p2381_p4, 1, 0 }
   0xc   : > { %s3325_s28 = scalar_select %p2386_p6, 1, 0 }
   0xd   : > { %p2391_p8 = pnand %p1856_p5, %p185_p7  ;;  %s197_s7 = sshll.u32 %s2297_s30, 4  ;;  %s2395_s7 = int_to_ptr.vmem [resolvable:$true] %s197_s7 }
   0xe   : > { %s2407_s9 = sadd.s32 1, %s2295_s24   ;;  %s30_s10 = sadd.s32 1, %s2291_s23 }
   0xf   : > { %s3326_s29 = scalar_select %p2391_p8, 1, 0 }
  0x10   : > { %p2075_p9 = pneg %p2391_p8  ;;  %s27_s11 = ssub.s32 %s2295_s24, %s2407_s9 }
  0x11   : > { %s2167_s14 = scalar_lea.hbm %s3309_s1, 1536 }
  0x12   : > { %p2402_p11 = pnand %p2075_p9, %p3315_p1  ;;  %p2168_p12 = scmp.ne.s32.totalorder %s3309_s1, %s2167_s14 }
  0x13   : > { %p2174_p5 = scmp.lt.u32.totalorder %s2167_s14, %s3309_s1 }
  0x14   : > { %p2169_p13 = pneg %p2402_p11 }
  0x16   : > { %p2170_p0 = pnand %p2169_p13, %p2168_p12 }
  0x18   : > { %p2171_p3 = pneg %p2170_p0 }
  0x1a   : > { %p2176_p7 = pnand %p2174_p5, %p2171_p3 }
  0x1c   : > { %2179 = shalt.err (!%p2176_p7)
}
  0x1d   : > { %s2180_s19 = scalar_lea.vmem %s2395_s7, 1536  ;;  %p2188_p2 = scmp.lt.s32.totalorder %s2395_s7, %s2395_s7 }
  0x1e   : > { %p2181_p9 = scmp.ne.s32.totalorder %s2395_s7, %s2180_s19  ;;  %p2189_p6 = scmp.lt.s32.totalorder %s2180_s19, %s2180_s19 }
  0x20   : > { %p2183_p10 = pnand %p2181_p9, %p2169_p13  ;;  %p2190_p4 = por %p2189_p6, %p2188_p2 }
  0x22   : > { %p2184_p1 = pneg %p2183_p10 }
  0x24   : > { %p2191_p8 = pnand %p2190_p4, %p2184_p1 }
  0x26   : > { %2194 = shalt.err (!%p2191_p8)
}
  0x27   : > { %s3318_s20 = smov 192   ;;  %s3319_s26 = smov 12  }
  0x28   : > { %2078 = dma.hbm_to_vmem [thread:$0]  (!%p2402_p11), %s3309_s1, 1536, %s2395_s7, [#allocation6], %s3318_s20, %s3318_s20, %s3319_s26  }
  0x29   : > { %p28_p1 = scmp.eq.s32.totalorder %s27_s11, 0  ;;  %p37_p2 = scmp.ne.s32.totalorder %s2291_s23, %s2287_s22 }
  0x2a   : > { %p38_p4 = scmp.eq.s32.totalorder %s2295_s24, 0  ;;  %p2088_p6 = scmp.lt.s32.totalorder %s2295_s24, 2 }
  0x2b   : > { %s2441_s13 = scalar_select %p28_p1, %s2291_s23, %s30_s10  }
  0x2c   : > { %p39_p8 = por %p38_p4, %p37_p2  ;;  %p3328_p10 = scmp.eq.s32.totalorder %s2372_s25, 1 }
  0x2d   : > { %s223_s8 = sand.u32 1, %s2291_s23   ;;  %s2063_s15 = smul.u32 768, %s2295_s24 }
  0x2e   : > { %p2445_p12 = por %p3328_p10, %p37_p2  ;;  %s2062_s16 = smul.u32 48, %s223_s8 }
  0x2f   : > { %p2451_p13 = pnand %p2088_p6, %p39_p8  ;;  %s2458_s10 = scalar_lea.hbm %s3308_s0, %s2063_s15 }
  0x30   : > { %s227_s18 = scalar_lea.vmem [#allocation2], %s2062_s16  ;;  %s2462_s30 = scalar_lea.sflag [#allocation3], %s223_s8 }
  0x31   : > { %s234_s19 = sshll.u32 %s227_s18, 4  ;;  %s2195_s12 = scalar_lea.hbm %s2458_s10, 768  ;;  %s2460_s19 = int_to_ptr.vmem [resolvable:$true] %s234_s19 }
  0x32   : > { %p2196_p11 = scmp.ne.s32.totalorder %s2458_s10, %s2195_s12  ;;  %p2197_p0 = pneg %p2451_p13 }
  0x33   : > { %s2200_s11 = scalar_lea.hbm %s3308_s0, 1536  ;;  %p2201_p7 = scmp.lt.u32.totalorder %s2458_s10, %s3308_s0 }
  0x34   : > { %p2198_p3 = pnand %p2197_p0, %p2196_p11  ;;  %p2202_p9 = scmp.lt.u32.totalorder %s2200_s11, %s2195_s12 }
  0x35   : > { %p2204_p2 = scmp.lt.u32.totalorder %s2195_s12, %s2458_s10 }
  0x36   : > { %p2199_p5 = pneg %p2198_p3  ;;  %p2203_p1 = por %p2202_p9, %p2201_p7 }
  0x38   : > { %p2205_p4 = por %p2204_p2, %p2203_p1 }
  0x3a   : > { %p2206_p6 = pnand %p2205_p4, %p2199_p5 }
  0x3c   : > { %2209 = shalt.err (!%p2206_p6)
}
  0x3d   : > { %s2210_s8 = scalar_lea.vmem %s2460_s19, 768  ;;  %s2300_s16 = smov [#allocation2]  }
  0x3e   : > { %p2211_p8 = scmp.ne.s32.totalorder %s2460_s19, %s2210_s8  ;;  %s2215_s18 = sshll.u32 %s2300_s16, 4  ;;  %s2216_s18 = int_to_ptr.vmem [resolvable:$false] %s2215_s18 }
  0x3f   : > { %s2217_s20 = scalar_lea.vmem %s2216_s18, 1536  ;;  %p2218_p3 = scmp.lt.s32.totalorder %s2460_s19, %s2216_s18 }
  0x40   : > { %p2213_p10 = pnand %p2211_p8, %p2197_p0  ;;  %p2219_p7 = scmp.lt.s32.totalorder %s2217_s20, %s2210_s8 }
  0x42   : > { %p2214_p11 = pneg %p2213_p10  ;;  %p2220_p9 = por %p2219_p7, %p2218_p3 }
  0x44   : > { %p2221_p1 = pnand %p2220_p9, %p2214_p11 }
  0x46   : > { %2224 = shalt.err (!%p2221_p1)
}
  0x47   : > { %s3331_s26 = smov 12   ;;  %s3332_s12 = smov 192  }
  0x48   : > { %2082 = dma.hbm_to_vmem [thread:$0]  (!%p2451_p13), %s2458_s10, 768, %s2460_s19, %s2462_s30, %s3332_s12, %s3332_s12, %s3331_s26  }
  0x49   : > { %p3333_p0 = scmp.ne.s32.totalorder %s3326_s29, 0 }
  0x4a   : > { %s2496_s15 = sand.u32 (!%p3333_p0), 1, %s2287_s22   ;;  %p3334_p5 = scmp.ne.s32.totalorder (!%p3333_p0), %s3324_s27, 0 }
  0x4b   : > { %246 = sbr.rel (%p3333_p0) target bundleno = 1215 (0x4bf), region = 44  ;;  %s249_s11 = scalar_lea.sflag (!%p3333_p0), [#allocation3], %s2496_s15 }
  0x4c   : > { %s2064_s7 = smul.u32 (!%p3333_p0), 48, %s2496_s15 }
  0x4e   : > { %s252_s8 = scalar_lea.vmem (!%p3333_p0), [#allocation2], %s2064_s7 }
  0x52   : > { %2270 = dma.done.wait (%p3334_p5), %s249_s11, 768  }
  0x53   : > { %2272 = vsyncadd (%p3334_p5), %s249_s11, 4294966528  ;;  %p3335_p2 = scmp.eq.s32.totalorder %s2372_s25, 0 }
  0x55   : > { %2274 = dma.done.wait (%p3335_p2), [#allocation6], 1536   ;;  %p3336_p13 = pmov %p3335_p2 }
  0x56   : > { %v2142_v0 = vld [vmem:[%s252_s8 + $0x4] ss:$12 sps:$4 sm:$0xff]   ;;  %v2508_v1 = vld [vmem:[%s252_s8] ss:$12 sps:$4 sm:$0xff]   ;;  %s2301_s29 = smov 127   ;;  %s2302_s27 = smov 126  }
  0x57   : > { %2276 = vsyncadd (%p3336_p13), [#allocation6], 4294965760  ;;  %328 = vrot.lane.b32.xlu0 %v2142_v0, %s2301_s29  ;;  %v2511_v2 = vld [vmem:[%s252_s8 + $0x8] ss:$12 sps:$4 sm:$0xff]   ;;  %647 = vmatprep.subr.bf16.mxu0 %v2142_v0  ;;  %v2516_v4 = vld [vmem:[%s252_s8 + $0x20] ss:$12 sps:$4 sm:$0xff]  }
  0x58   : > { %326 = vrot.lane.b32.xlu1 %v2508_v1, %s2301_s29  ;;  %v2146_v3 = vld [vmem:[%s252_s8 + $0x1c] ss:$12 sps:$4 sm:$0xff]   ;;  %648 = vmatpush1.bf16.msra.mxu0 %v2508_v1  ;;  %v2149_v5 = vld [vmem:[%s252_s8 + $0x18] ss:$12 sps:$4 sm:$0xff]   ;;  %s2303_s17 = smov 110   ;;  %s2304_s10 = smov 109  }
  0x59   : > { %649 = vmatprep.subr.bf16.mxu0 %v2146_v3  ;;  %s2305_s19 = smov 108   ;;  %s2306_s30 = smov 92   ;;  %v2152_v6 = vld [vmem:[#allocation5 + $0x4] ss:$12 sps:$4 sm:$0xff]   ;;  %v2309_v7 = vmov 0   ;;  %vm338_vm0 = vcmask 1039360  }
  0x5a   : > { %825 = vmatprep.mubr.bf16.mxu1 %v2152_v6  ;;  %679 = vmatprep.mubr.bf16.mxu0 %v2152_v6  ;;  %s3322_s16 = smov 91   ;;  %s3320_s18 = smov 90   ;;  %vm361_vm1 = vcmask 1031168   ;;  %v526_v21 = vld [vmem:[%s3310_s2] sm:$0xff]  ;;  %v527_v22 = vld [vmem:[%s3310_s2 + $0x8] sm:$0xff]  ;;  %v529_v24 = vld [vmem:[%s3310_s2 + $0x18] sm:$0xff] }
  0x5b   : > { %330 = vrot.lane.b32.xlu0 %v2511_v2, %s2301_s29  ;;  %2141 = vset.pattern.permute.xlu1 %v2309_v7  ;;  %v528_v27 = vld [vmem:[%s3310_s2 + $0x10] sm:$0xff]  ;;  %v531_v29 = vld [vmem:[%s3310_s2 + $0x28] sm:$0xff]  ;;  %v530_v32 = vld [vmem:[%s3310_s2 + $0x20] sm:$0xff]  ;;  %vm384_vm2 = vcmask 900096   ;;  %vm407_vm3 = vcmask 891904   ;;  %vm430_vm4 = vcmask 883712  }
  0x5c   : > { %334 = vrot.lane.b32.xlu1 %v2146_v3, %s2301_s29  ;;  %650 = vmatpush1.bf16.msra.mxu0 %v2149_v5  ;;  %v533_v35 = vld [vmem:[%s3310_s2 + $0x38] sm:$0xff]  ;;  %v532_v37 = vld [vmem:[%s3310_s2 + $0x30] sm:$0xff]  ;;  %vm453_vm5 = vcmask 752640   ;;  %vm476_vm6 = vcmask 744448   ;;  %vm499_vm7 = vcmask 736256   ;;  %vm634_vm8 = vcmask 261120  }
  0x5d   : > { %2140 = vset.pattern.permute.xlu0 %v2309_v7  ;;  %s2310_s12 = smov 19   ;;  %vm1036_vm9 = vcmask 154624   ;;  %vm1063_vm10 = vcmask 416768   ;;  %vm2313_vm12 = vmmov 0   ;;  %vm1487_vm13 = vcmask 523264  }
  0x5e   : > { %vm2780_vm11 = vmneg %vm1036_vm9  ;;  %vm1754_vm14 = vcmask 1041408   ;;  %vm1755_vm15 = vcmask 1043458  }
  0x5f   : > { %336 = vrot.lane.b32.xlu0 %v2516_v4, %s2301_s29 }
  0x60   : > { %332 = vrot.lane.b32.xlu1 %v2149_v5, %s2301_s29 }
  0x63   : > { %351 = vrot.lane.b32.xlu0 %v2142_v0, %s2302_s27 }
  0x64   : > { %353 = vrot.lane.b32.xlu1 %v2511_v2, %s2302_s27 }
  0x67   : > { %349 = vrot.lane.b32.xlu0 %v2508_v1, %s2302_s27 }
  0x68   : > { %357 = vrot.lane.b32.xlu1 %v2146_v3, %s2302_s27 }
  0x6b   : > { %359 = vrot.lane.b32.xlu0 %v2516_v4, %s2302_s27 }
  0x6c   : > { %355 = vrot.lane.b32.xlu1 %v2149_v5, %s2302_s27 }
  0x6f   : > { %374 = vrot.lane.b32.xlu0 %v2142_v0, %s2303_s17 }
  0x70   : > { %376 = vrot.lane.b32.xlu1 %v2511_v2, %s2303_s17 }
  0x73   : > { %372 = vrot.lane.b32.xlu0 %v2508_v1, %s2303_s17 }
  0x74   : > { %380 = vrot.lane.b32.xlu1 %v2146_v3, %s2303_s17 }
  0x77   : > { %382 = vrot.lane.b32.xlu0 %v2516_v4, %s2303_s17 }
  0x78   : > { %378 = vrot.lane.b32.xlu1 %v2149_v5, %s2303_s17 }
  0x7b   : > { %397 = vrot.lane.b32.xlu0 %v2142_v0, %s2304_s10 }
  0x7c   : > { %399 = vrot.lane.b32.xlu1 %v2511_v2, %s2304_s10 }
  0x7f   : > { %395 = vrot.lane.b32.xlu0 %v2508_v1, %s2304_s10 }
  0x80   : > { %403 = vrot.lane.b32.xlu1 %v2146_v3, %s2304_s10 }
  0x83   : > { %405 = vrot.lane.b32.xlu0 %v2516_v4, %s2304_s10 }
  0x84   : > { %401 = vrot.lane.b32.xlu1 %v2149_v5, %s2304_s10 }
  0x87   : > { %420 = vrot.lane.b32.xlu0 %v2142_v0, %s2305_s19 }
  0x88   : > { %422 = vrot.lane.b32.xlu1 %v2511_v2, %s2305_s19 }
  0x8b   : > { %418 = vrot.lane.b32.xlu0 %v2508_v1, %s2305_s19 }
  0x8c   : > { %426 = vrot.lane.b32.xlu1 %v2146_v3, %s2305_s19 }
  0x8f   : > { %428 = vrot.lane.b32.xlu0 %v2516_v4, %s2305_s19 }
  0x90   : > { %424 = vrot.lane.b32.xlu1 %v2149_v5, %s2305_s19 }
  0x93   : > { %443 = vrot.lane.b32.xlu0 %v2142_v0, %s2306_s30 }
  0x94   : > { %445 = vrot.lane.b32.xlu1 %v2511_v2, %s2306_s30 }
  0x97   : > { %441 = vrot.lane.b32.xlu0 %v2508_v1, %s2306_s30 }
  0x98   : > { %449 = vrot.lane.b32.xlu1 %v2146_v3, %s2306_s30 }
  0x9b   : > { %451 = vrot.lane.b32.xlu0 %v2516_v4, %s2306_s30 }
  0x9c   : > { %447 = vrot.lane.b32.xlu1 %v2149_v5, %s2306_s30 }
  0x9f   : > { %466 = vrot.lane.b32.xlu0 %v2142_v0, %s3322_s16 }
  0xa0   : > { %468 = vrot.lane.b32.xlu1 %v2511_v2, %s3322_s16 }
  0xa3   : > { %464 = vrot.lane.b32.xlu0 %v2508_v1, %s3322_s16 }
  0xa4   : > { %472 = vrot.lane.b32.xlu1 %v2146_v3, %s3322_s16 }
  0xa7   : > { %474 = vrot.lane.b32.xlu0 %v2516_v4, %s3322_s16 }
  0xa8   : > { %470 = vrot.lane.b32.xlu1 %v2149_v5, %s3322_s16  ;;  %s2066_s16 = smul.u32 96, %s2372_s25  ;;  %s2315_s25 = smov [#allocation7]  }
  0xa9   : > { %s2229_s7 = sshll.u32 %s2315_s25, 4  ;;  %s2230_s7 = int_to_ptr.vmem [resolvable:$false] %s2229_s7 }
  0xaa   : > { %s3264_s26 = scalar_lea.hbm %s3314_s6, %s2066_s16 }
  0xab   : > { %489 = vrot.lane.b32.xlu0 %v2142_v0, %s3320_s18 }
  0xac   : > { %491 = vrot.lane.b32.xlu1 %v2511_v2, %s3320_s18 }
  0xaf   : > { %487 = vrot.lane.b32.xlu0 %v2508_v1, %s3320_s18 }
  0xb0   : > { %495 = vrot.lane.b32.xlu1 %v2146_v3, %s3320_s18 }
  0xb3   : > { %497 = vrot.lane.b32.xlu0 %v2516_v4, %s3320_s18 }
  0xb4   : > { %493 = vrot.lane.b32.xlu1 %v2149_v5, %s3320_s18 }
  0xb7   : > { %536 = vperm.xlu0 %2140, %v526_v21  }
  0xb8   : > { %541 = vperm.xlu1 %2141, %v527_v22   ;;  %v2150_v22 = vld [vmem:[#allocation5] ss:$12 sps:$4 sm:$0xff]  }
  0xbb   : > { %551 = vperm.xlu0 %2140, %v529_v24  }
  0xbc   : > { %546 = vperm.xlu1 %2141, %v528_v27  }
  0xbf   : > { %561 = vperm.xlu0 %2140, %v531_v29  }
  0xc0   : > { %556 = vperm.xlu1 %2141, %v530_v32   ;;  %v2156_v32 = vld [vmem:[#allocation5 + $0x34] ss:$12 sps:$4 sm:$0xff]  }
  0xc3   : > { %571 = vperm.xlu0 %2140, %v533_v35  }
  0xc4   : > { %566 = vperm.xlu1 %2141, %v532_v37   ;;  %v2158_v37 = vld [vmem:[#allocation5 + $0x30] ss:$12 sps:$4 sm:$0xff]  }
  0xc9   : > { %v329_v8 = vpop.permute.xlu0 %328 }
  0xca   : > { %v327_v9 = vpop.permute.xlu1 %326 }
  0xcb   : > { %v339_v13 = vsel %vm338_vm0, %v327_v9, %v329_v8 }
  0xcd   : > { %v2589_v10 = vpop.permute.xlu0 %330 }
  0xce   : > { %v335_v11 = vpop.permute.xlu1 %334  ;;  %v340_v12 = vsel %vm338_vm0, %v329_v8, %v2589_v10 }
  0xcf   : > { %651 = vmatprep.subr.bf16.mxu0 %v340_v12 }
  0xd0   : > { %652 = vmatpush1.bf16.msra.mxu0 %v339_v13 }
  0xd1   : > { %v2594_v14 = vpop.permute.xlu0 %336 }
  0xd2   : > { %v333_v15 = vpop.permute.xlu1 %332  ;;  %v342_v16 = vsel %vm338_vm0, %v335_v11, %v2594_v14 }
  0xd3   : > { %653 = vmatprep.subr.bf16.mxu0 %v342_v16  ;;  %v341_v17 = vsel %vm338_vm0, %v333_v15, %v335_v11 }
  0xd4   : > { %654 = vmatpush1.bf16.msra.mxu0 %v341_v17 }
  0xd5   : > { %v352_v18 = vpop.permute.xlu0 %351 }
  0xd6   : > { %v2599_v19 = vpop.permute.xlu1 %353 }
  0xd7   : > { %v363_v20 = vsel %vm361_vm1, %v352_v18, %v2599_v19 }
  0xd8   : > { %655 = vmatprep.subr.bf16.mxu0 %v363_v20 }
  0xd9   : > { %v350_v23 = vpop.permute.xlu0 %349 }
  0xda   : > { %v358_v25 = vpop.permute.xlu1 %357  ;;  %v362_v26 = vsel %vm361_vm1, %v350_v23, %v352_v18 }
  0xdb   : > { %656 = vmatpush1.bf16.msra.mxu0 %v362_v26 }
  0xdd   : > { %v2616_v28 = vpop.permute.xlu0 %359 }
  0xde   : > { %v356_v30 = vpop.permute.xlu1 %355  ;;  %v365_v31 = vsel %vm361_vm1, %v358_v25, %v2616_v28 }
  0xdf   : > { %657 = vmatprep.subr.bf16.mxu0 %v365_v31  ;;  %v364_v33 = vsel %vm361_vm1, %v356_v30, %v358_v25  ;;  %v2153_v25 = vld [vmem:[#allocation5 + $0x1c] ss:$12 sps:$4 sm:$0xff]   ;;  %v2155_v30 = vld [vmem:[#allocation5 + $0x18] ss:$12 sps:$4 sm:$0xff]  }
  0xe0   : > { %658 = vmatpush1.bf16.msra.mxu0 %v364_v33 }
  0xe1   : > { %v375_v34 = vpop.permute.xlu0 %374 }
  0xe2   : > { %v2630_v36 = vpop.permute.xlu1 %376 }
  0xe3   : > { %v386_v38 = vsel %vm384_vm2, %v375_v34, %v2630_v36 }
  0xe4   : > { %659 = vmatprep.subr.bf16.mxu0 %v386_v38  ;;  %v2159_v38 = vld [vmem:[#allocation5 + $0x4c] ss:$12 sps:$4 sm:$0xff]  }
  0xe5   : > { %v373_v39 = vpop.permute.xlu0 %372 }
  0xe6   : > { %v381_v40 = vpop.permute.xlu1 %380  ;;  %v385_v41 = vsel %vm384_vm2, %v373_v39, %v375_v34  ;;  %v2161_v39 = vld [vmem:[#allocation5 + $0x48] ss:$12 sps:$4 sm:$0xff]  }
  0xe7   : > { %660 = vmatpush1.bf16.msra.mxu0 %v385_v41  ;;  %v2163_v41 = vld [vmem:[#allocation5 + $0x20] ss:$12 sps:$4 sm:$0xff]  }
  0xe9   : > { %v2638_v42 = vpop.permute.xlu0 %382 }
  0xea   : > { %v379_v43 = vpop.permute.xlu1 %378  ;;  %v388_v44 = vsel %vm384_vm2, %v381_v40, %v2638_v42 }
  0xeb   : > { %661 = vmatprep.subr.bf16.mxu0 %v388_v44  ;;  %v387_v45 = vsel %vm384_vm2, %v379_v43, %v381_v40  ;;  %v2162_v40 = vld [vmem:[#allocation5 + $0x8] ss:$12 sps:$4 sm:$0xff]   ;;  %v2165_v43 = vld [vmem:[#allocation5 + $0x50] ss:$12 sps:$4 sm:$0xff]  }
  0xec   : > { %662 = vmatpush1.bf16.msra.mxu0 %v387_v45 }
  0xed   : > { %v398_v46 = vpop.permute.xlu0 %397 }
  0xee   : > { %v400_v47 = vpop.permute.xlu1 %399 }
  0xef   : > { %1901 = vmatprep.subr.bf16.mxu1 %v400_v47  ;;  %v409_v48 = vsel %vm407_vm3, %v398_v46, %v400_v47 }
  0xf0   : > { %663 = vmatprep.subr.bf16.mxu0 %v409_v48  ;;  %1902 = vmatpush3.bf16.msra.mxu1 %v2511_v2 }
  0xf1   : > { %v396_v49 = vpop.permute.xlu0 %395 }
  0xf2   : > { %v404_v50 = vpop.permute.xlu1 %403  ;;  %v408_v51 = vsel %vm407_vm3, %v396_v49, %v398_v46 }
  0xf3   : > { %664 = vmatpush1.bf16.msra.mxu0 %v408_v51 }
  0xf5   : > { %v406_v52 = vpop.permute.xlu0 %405 }
  0xf6   : > { %v402_v53 = vpop.permute.xlu1 %401  ;;  %1903 = vmatprep.subr.bf16.mxu1 %v406_v52  ;;  %v411_v54 = vsel %vm407_vm3, %v404_v50, %v406_v52 }
  0xf7   : > { %665 = vmatprep.subr.bf16.mxu0 %v411_v54  ;;  %1904 = vmatpush3.bf16.msra.mxu1 %v2516_v4  ;;  %v410_v55 = vsel %vm407_vm3, %v402_v53, %v404_v50 }
  0xf8   : > { %666 = vmatpush1.bf16.msra.mxu0 %v410_v55 }
  0xf9   : > { %v421_v56 = vpop.permute.xlu0 %420 }
  0xfa   : > { %v423_v57 = vpop.permute.xlu1 %422 }
  0xfb   : > { %1905 = vmatprep.subr.bf16.mxu1 %v423_v57  ;;  %v432_v58 = vsel %vm430_vm4, %v421_v56, %v423_v57 }
  0xfc   : > { %667 = vmatprep.subr.bf16.mxu0 %v432_v58  ;;  %1906 = vmatpush3.bf16.msra.mxu1 %v2589_v10 }
  0xfd   : > { %v419_v59 = vpop.permute.xlu0 %418 }
  0xfe   : > { %v427_v60 = vpop.permute.xlu1 %426  ;;  %v431_v61 = vsel %vm430_vm4, %v419_v59, %v421_v56 }
  0xff   : > { %668 = vmatpush1.bf16.msra.mxu0 %v431_v61 }
 0x101   : > { %v429_v62 = vpop.permute.xlu0 %428 }
 0x102   : > { %v425_v63 = vpop.permute.xlu1 %424  ;;  %1907 = vmatprep.subr.bf16.mxu1 %v429_v62  ;;  %v434_v0 = vsel %vm430_vm4, %v427_v60, %v429_v62 }
 0x103   : > { %669 = vmatprep.subr.bf16.mxu0 %v434_v0  ;;  %1908 = vmatpush3.bf16.msra.mxu1 %v2594_v14  ;;  %v433_v1 = vsel %vm430_vm4, %v425_v63, %v427_v60  ;;  %v949_v63 = vlaneseq }
 0x104   : > { %670 = vmatpush1.bf16.msra.mxu0 %v433_v1 }
 0x105   : > { %v444_v2 = vpop.permute.xlu0 %443 }
 0x106   : > { %v446_v3 = vpop.permute.xlu1 %445 }
 0x107   : > { %1909 = vmatprep.subr.bf16.mxu1 %v446_v3  ;;  %v455_v4 = vsel %vm453_vm5, %v444_v2, %v446_v3 }
 0x108   : > { %671 = vmatprep.subr.bf16.mxu0 %v455_v4  ;;  %1910 = vmatpush3.bf16.msra.mxu1 %v2599_v19  ;;  %v2685_v4 = vshrl.u32 %v949_v63, 7 }
 0x109   : > { %v442_v5 = vpop.permute.xlu0 %441 }
 0x10a   : > { %v450_v6 = vpop.permute.xlu1 %449  ;;  %v454_v8 = vsel %vm453_vm5, %v442_v5, %v444_v2 }
 0x10b   : > { %672 = vmatpush1.bf16.msra.mxu0 %v454_v8 }
 0x10d   : > { %v452_v9 = vpop.permute.xlu0 %451 }
 0x10e   : > { %v448_v10 = vpop.permute.xlu1 %447  ;;  %1911 = vmatprep.subr.bf16.mxu1 %v452_v9  ;;  %v457_v11 = vsel %vm453_vm5, %v450_v6, %v452_v9 }
 0x10f   : > { %673 = vmatprep.subr.bf16.mxu0 %v457_v11  ;;  %1912 = vmatpush3.bf16.msra.mxu1 %v2616_v28  ;;  %v456_v12 = vsel %vm453_vm5, %v448_v10, %v450_v6 }
 0x110   : > { %674 = vmatpush1.bf16.msra.mxu0 %v456_v12  ;;  %v959_v12 = vsub.s32 2, %v2685_v4 }
 0x111   : > { %v467_v13 = vpop.permute.xlu0 %466 }
 0x112   : > { %v469_v14 = vpop.permute.xlu1 %468 }
 0x113   : > { %1913 = vmatprep.subr.bf16.mxu1 %v469_v14  ;;  %v478_v15 = vsel %vm476_vm6, %v467_v13, %v469_v14  ;;  %v951_v14 = vsub.s32 0, %v2685_v4 }
 0x114   : > { %675 = vmatprep.subr.bf16.mxu0 %v478_v15  ;;  %1914 = vmatpush3.bf16.msra.mxu1 %v2630_v36 }
 0x115   : > { %v465_v16 = vpop.permute.xlu0 %464 }
 0x116   : > { %v473_v17 = vpop.permute.xlu1 %472  ;;  %v477_v18 = vsel %vm476_vm6, %v465_v16, %v467_v13  ;;  %v947_v13 = vld [vmem:[%s3313_s5] sm:$0x7] }
 0x117   : > { %676 = vmatpush1.bf16.msra.mxu0 %v477_v18 }
 0x119   : > { %v475_v19 = vpop.permute.xlu0 %474 }
 0x11a   : > { %v471_v20 = vpop.permute.xlu1 %470  ;;  %1915 = vmatprep.subr.bf16.mxu1 %v475_v19  ;;  %v480_v21 = vsel %vm476_vm6, %v473_v17, %v475_v19 }
 0x11b   : > { %677 = vmatprep.subr.bf16.mxu0 %v480_v21  ;;  %1916 = vmatpush3.bf16.msra.mxu1 %v2638_v42  ;;  %v479_v23 = vsel %vm476_vm6, %v471_v20, %v473_v17  ;;  %v2164_v42 = vld [vmem:[#allocation5 + $0x38] ss:$12 sps:$4 sm:$0xff]   ;;  %v955_v17 = vsub.s32 1, %v2685_v4 }
 0x11c   : > { %678 = vmatpush1.bf16.msra.mxu0 %v479_v23 }
 0x11d   : > { %v490_v24 = vpop.permute.xlu0 %489 }
 0x11e   : > { %v492_v26 = vpop.permute.xlu1 %491  ;;  %826 = vmatmul.mubr.bf16.vlgmr.msra.gmra.mrb[0].mxu1 %v2150_v22 }
 0x11f   : > { %1996 = vmatprep.subr.bf16.mxu1 %v492_v26  ;;  %680 = vmatmul.mubr.bf16.vlgmr.msra.gmra.mrb[0].mxu0 %v2150_v22  ;;  %v501_v27 = vsel %vm499_vm7, %v490_v24, %v492_v26  ;;  %v2702_v22 = vrot.slane %v947_v13, %v959_v12 }
 0x120   : > { %720 = vmatprep.subr.bf16.mxu0 %v501_v27  ;;  %1997 = vmatpush3.bf16.msra.mxu1 %v492_v26  ;;  %v2705_v27 = vrot.slane %v947_v13, %v951_v14 }
 0x121   : > { %v488_v28 = vpop.permute.xlu0 %487  ;;  %833 = vmatprep.mubr.bf16.mxu1 %v2153_v25  ;;  %689 = vmatprep.mubr.bf16.mxu0 %v2153_v25 }
 0x122   : > { %v500_v29 = vsel %vm499_vm7, %v488_v28, %v490_v24  ;;  %v496_v31 = vpop.permute.xlu1 %495 }
 0x123   : > { %721 = vmatpush1.bf16.msra.mxu0 %v500_v29 }
 0x125   : > { %v498_v33 = vpop.permute.xlu0 %497 }
 0x126   : > { %834 = vmatmul.mubr.bf16.gmra.mrb[4].mxu1 %v2155_v30  ;;  %1998 = vmatprep.subr.bf16.mxu1 %v498_v33  ;;  %v503_v34 = vsel %vm499_vm7, %v496_v31, %v498_v33  ;;  %v494_v35 = vpop.permute.xlu1 %493 }
 0x127   : > { %690 = vmatmul.mubr.bf16.gmra.mrb[4].mxu0 %v2155_v30  ;;  %841 = vmatprep.mubr.bf16.mxu1 %v2156_v32  ;;  %v502_v36 = vsel %vm499_vm7, %v494_v35, %v496_v31 }
 0x128   : > { %699 = vmatprep.mubr.bf16.mxu0 %v2156_v32  ;;  %1999 = vmatpush3.bf16.msra.mxu1 %v498_v33 }
 0x129   : > { %722 = vmatprep.subr.bf16.mxu0 %v503_v34  ;;  %v2707_v34 = vrot.slane %v947_v13, %v955_v17 }
 0x12a   : > { %723 = vmatpush1.bf16.msra.mxu0 %v502_v36 }
 0x12e   : > { %842 = vmatmul.mubr.bf16.gmra.mrb[8].mxu1 %v2158_v37 }
 0x12f   : > { %700 = vmatmul.mubr.bf16.gmra.mrb[8].mxu0 %v2158_v37  ;;  %849 = vmatprep.mubr.bf16.mxu1 %v2159_v38 }
 0x130   : > { %709 = vmatprep.mubr.bf16.mxu0 %v2159_v38 }
 0x136   : > { %850 = vmatmul.mubr.bf16.gmra.mrb[12].mxu1 %v2161_v39  ;;  %v537_v0 = vpop.permute.xlu0 %536 }
 0x137   : > { %710 = vmatmul.mubr.bf16.gmra.mrb[12].mxu0 %v2161_v39  ;;  %2000 = vmatprep.mubr.msk.bf16.mxu1 %vm634_vm8, %v2162_v40  ;;  %v542_v61 = vpop.permute.xlu1 %541 }
 0x138   : > { %752 = vmatprep.mubr.bf16.mxu0 %v2309_v7 }
 0x13a   : > { %v2687_v8 = vpop.permute.xlu0 %551 }
 0x13b   : > { %v2683_v1 = vpop.permute.xlu1 %546 }
 0x13e   : > { %2001 = vmatmul.mubr.msk.bf16.vlgmr.msra.gmra.mrb[16].mxu1 %vm634_vm8, %v2163_v41  ;;  %v2696_v15 = vpop.permute.xlu0 %561 }
 0x13f   : > { %1880 = vmatmul.mubr.msk.bf16.vlgmr.msra.gmra.mrb[0].mxu0 %vm634_vm8, %v2162_v40  ;;  %2004 = vmatprep.mubr.msk.bf16.mxu1 %vm634_vm8, %v2164_v42  ;;  %v2689_v10 = vpop.permute.xlu1 %556 }
 0x140   : > { %762 = vmatprep.mubr.bf16.mxu0 %v2309_v7 }
 0x142   : > { %v2709_v38 = vpop.permute.xlu0 %571 }
 0x143   : > { %v2700_v18 = vpop.permute.xlu1 %566 }
 0x146   : > { %2005 = vmatmul.mubr.msk.bf16.gmra.mrb[20].mxu1 %vm634_vm8, %v2165_v43 }
 0x147   : > { %1881 = vmatmul.mubr.msk.bf16.gmra.mrb[4].mxu0 %vm634_vm8, %v2163_v41 }
 0x148   : > { %772 = vmatprep.mubr.bf16.mxu0 %v2309_v7 }
 0x14f   : > { %1882 = vmatmul.mubr.msk.bf16.gmra.mrb[8].mxu0 %vm634_vm8, %v2164_v42 }
 0x150   : > { %782 = vmatprep.mubr.bf16.mxu0 %v2309_v7 }
 0x157   : > { %1883 = vmatmul.mubr.msk.bf16.gmra.mrb[12].mxu0 %vm634_vm8, %v2165_v43 }
 0x1f1   : > { %v1917_v44 = vpop.f32.mrb[0].mxu1 }
 0x1f2   : > { %v1918_v45 = vpop.f32.mrb[1].mxu1 }
 0x1f3   : > { %v1919_v46 = vadd.f32 %v1918_v45, %v1917_v44  ;;  %v1920_v47 = vpop.f32.mrb[2].mxu1 }
 0x1f4   : > { %v1921_v48 = vpop.f32.mrb[3].mxu1 }
 0x1f5   : > { %v1922_v49 = vadd.f32 %v1921_v48, %v1920_v47  ;;  %v828_v20 = vadd.f32 %v1919_v46, %v537_v0 }
 0x1f7   : > { %v831_v31 = vadd.f32 %v1922_v49, %v542_v61 }
 0x1f9   : > { %v1923_v50 = vpop.f32.mrb[4].mxu1 }
 0x1fa   : > { %v1924_v51 = vpop.f32.mrb[5].mxu1 }
 0x1fb   : > { %v1925_v52 = vadd.f32 %v1924_v51, %v1923_v50  ;;  %v1926_v53 = vpop.f32.mrb[6].mxu1 }
 0x1fc   : > { %v1927_v54 = vpop.f32.mrb[7].mxu1 }
 0x1fd   : > { %v1928_v55 = vadd.f32 %v1927_v54, %v1926_v53  ;;  %v836_v16 = vadd.f32 %v1925_v52, %v2683_v1 }
 0x1ff   : > { %v839_v25 = vadd.f32 %v1928_v55, %v2687_v8 }
 0x201   : > { %v1929_v56 = vpop.f32.mrb[8].mxu1 }
 0x202   : > { %v1930_v57 = vpop.f32.mrb[9].mxu1 }
 0x203   : > { %v1931_v58 = vadd.f32 %v1930_v57, %v1929_v56  ;;  %v1932_v59 = vpop.f32.mrb[10].mxu1 }
 0x204   : > { %v1933_v60 = vpop.f32.mrb[11].mxu1 }
 0x205   : > { %v1934_v62 = vadd.f32 %v1933_v60, %v1932_v59  ;;  %v844_v47 = vadd.f32 %v1931_v58, %v2689_v10 }
 0x207   : > { %v847_v51 = vadd.f32 %v1934_v62, %v2696_v15 }
 0x209   : > { %v1935_v2 = vpop.f32.mrb[12].mxu1 }
 0x20a   : > { %v1936_v3 = vpop.f32.mrb[13].mxu1 }
 0x20b   : > { %v1937_v5 = vadd.f32 %v1936_v3, %v1935_v2  ;;  %v1938_v6 = vpop.f32.mrb[14].mxu1 }
 0x20c   : > { %v1939_v9 = vpop.f32.mrb[15].mxu1 }
 0x20d   : > { %v1940_v11 = vadd.f32 %v1939_v9, %v1938_v6  ;;  %v852_v50 = vadd.f32 %v1937_v5, %v2700_v18 }
 0x20f   : > { %v855_v55 = vadd.f32 %v1940_v11, %v2709_v38 }
 0x211   : > { %v2002_v19 = vpop.f32.mrb[16].mxu1 }
 0x212   : > { %v901_v21 = vadd.f32 %v2002_v19, %v836_v16  ;;  %v754_v23 = vpop.f32.mrb[0].mxu0  ;;  %v892_v24 = vpop.f32.mrb[17].mxu1 }
 0x213   : > { %v2020_v26 = vadd.f32 %v754_v23, %v537_v0  ;;  %v893_v28 = vadd.f32 %v892_v24, %v828_v20  ;;  %v756_v29 = vpop.f32.mrb[1].mxu0  ;;  %v2003_v30 = vpop.f32.mrb[18].mxu1 }
 0x214   : > { %v931_v32 = vmax.f32 %v901_v21, 0.0  ;;  %v2021_v33 = vadd.f32 %v756_v29, %v537_v0  ;;  %v904_v35 = vadd.f32 %v2003_v30, %v839_v25  ;;  %v758_v36 = vpop.f32.mrb[2].mxu0  ;;  %v895_v37 = vpop.f32.mrb[19].mxu1 }
 0x215   : > { %v923_v39 = vmax.f32 %v2020_v26, 0.0  ;;  %v925_v40 = vmax.f32 %v893_v28, 0.0  ;;  %v2022_v41 = vadd.f32 %v758_v36, %v542_v61  ;;  %v896_v42 = vadd.f32 %v895_v37, %v831_v31  ;;  %v760_v43 = vpop.f32.mrb[3].mxu0 }
 0x216   : > { %v924_v44 = vmax.f32 %v2021_v33, 0.0  ;;  %v934_v45 = vmax.f32 %v904_v35, 0.0  ;;  %v2023_v46 = vadd.f32 %v760_v43, %v542_v61  ;;  %v972_v52 = vmul.f32 %v2702_v22, %v931_v32 }
 0x217   : > { %v926_v48 = vmax.f32 %v2022_v41, 0.0  ;;  %v928_v49 = vmax.f32 %v896_v42, 0.0  ;;  %v2718_v56 = vmul.f32 %v2705_v27, %v923_v39  ;;  %v966_v57 = vmul.f32 %v2702_v22, %v925_v40 }
 0x218   : > { %v975_v53 = vmul.f32 %v2702_v22, %v934_v45  ;;  %v927_v54 = vmax.f32 %v2023_v46, 0.0  ;;  %v2724_v61 = vmul.f32 %v2707_v34, %v924_v44 }
 0x219   : > { %v967_v58 = vmul.f32 %v2705_v27, %v926_v48  ;;  %v969_v59 = vmul.f32 %v2702_v22, %v928_v49  ;;  %v2006_v60 = vpop.f32.mrb[20].mxu1 }
 0x21a   : > { %v2727_v62 = vmul.f32 %v2707_v34, %v927_v54  ;;  %v917_v63 = vadd.f32 %v2006_v60, %v852_v50  ;;  %v764_v0 = vpop.f32.mrb[4].mxu0  ;;  %v908_v2 = vpop.f32.mrb[21].mxu1  ;;  %v993_v3 = vpack.c.bf16 %v975_v53, %v972_v52 }
 0x21b   : > { %v2024_v5 = vadd.f32 %v764_v0, %v2683_v1  ;;  %v909_v6 = vadd.f32 %v908_v2, %v844_v47  ;;  %v766_v9 = vpop.f32.mrb[5].mxu0  ;;  %v2007_v11 = vpop.f32.mrb[22].mxu1  ;;  %v990_v12 = vpack.c.bf16 %v969_v59, %v966_v57  ;;  %v988_v13 = vpack.c.bf16 %v967_v58, %v2718_v56 }
 0x21c   : > { %v943_v14 = vmax.f32 %v917_v63, 0.0  ;;  %v2025_v16 = vadd.f32 %v766_v9, %v2683_v1  ;;  %v920_v17 = vadd.f32 %v2007_v11, %v855_v55  ;;  %v911_v19 = vpop.f32.mrb[23].mxu1  ;;  %1022 = vrot.lane.b32.xlu1 %v993_v3, %s2310_s12  ;;  %v768_v20 = vpop.f32.mrb[6].mxu0  ;;  %v989_v21 = vpack.c.bf16 %v2727_v62, %v2724_v61 }
 0x21d   : > { %v929_v23 = vmax.f32 %v2024_v5, 0.0  ;;  %v937_v24 = vmax.f32 %v909_v6, 0.0  ;;  %v912_v25 = vadd.f32 %v911_v19, %v847_v51  ;;  %v2026_v26 = vadd.f32 %v768_v20, %v2687_v8  ;;  %1016 = vrot.lane.b32.xlu0 %v990_v12, %s2310_s12  ;;  %v770_v28 = vpop.f32.mrb[7].mxu0 }
 0x21e   : > { %v930_v29 = vmax.f32 %v2025_v16, 0.0  ;;  %v946_v30 = vmax.f32 %v920_v17, 0.0  ;;  %v2027_v1 = vadd.f32 %v770_v28, %v2687_v8  ;;  %v984_v33 = vmul.f32 %v2702_v22, %v943_v14 }
 0x21f   : > { %v940_v31 = vmax.f32 %v912_v25, 0.0  ;;  %v932_v32 = vmax.f32 %v2026_v26, 0.0  ;;  %v970_v37 = vmul.f32 %v2705_v27, %v929_v23  ;;  %v978_v39 = vmul.f32 %v2702_v22, %v937_v24 }
 0x220   : > { %v987_v35 = vmul.f32 %v2702_v22, %v946_v30  ;;  %v933_v36 = vmax.f32 %v2027_v1, 0.0  ;;  %v971_v42 = vmul.f32 %v2707_v34, %v930_v29 }
 0x221   : > { %v981_v40 = vmul.f32 %v2702_v22, %v940_v31  ;;  %v973_v41 = vmul.f32 %v2705_v27, %v932_v32 }
 0x222   : > { %v974_v43 = vmul.f32 %v2707_v34, %v933_v36  ;;  %v774_v8 = vpop.f32.mrb[8].mxu0  ;;  %v999_v44 = vpack.c.bf16 %v987_v35, %v984_v33 }
 0x223   : > { %v2028_v45 = vadd.f32 %v774_v8, %v2689_v10  ;;  %v776_v46 = vpop.f32.mrb[9].mxu0  ;;  %v996_v47 = vpack.c.bf16 %v981_v40, %v978_v39  ;;  %v991_v48 = vpack.c.bf16 %v973_v41, %v970_v37 }
 0x224   : > { %v2029_v49 = vadd.f32 %v776_v46, %v2689_v10  ;;  %1034 = vrot.lane.b32.xlu1 %v999_v44, %s2310_s12  ;;  %v778_v50 = vpop.f32.mrb[10].mxu0  ;;  %v992_v51 = vpack.c.bf16 %v974_v43, %v971_v42 }
 0x225   : > { %v935_v22 = vmax.f32 %v2028_v45, 0.0  ;;  %v2030_v52 = vadd.f32 %v778_v50, %v2696_v15  ;;  %1028 = vrot.lane.b32.xlu0 %v996_v47, %s2310_s12  ;;  %v780_v53 = vpop.f32.mrb[11].mxu0  ;;  %v2311_v50 = vmov 1966171168  }
 0x226   : > { %v936_v54 = vmax.f32 %v2029_v49, 0.0  ;;  %v2031_v55 = vadd.f32 %v780_v53, %v2696_v15  ;;  %v2930_v53 = vld [vmem:[%s3311_s3] sm:$0x1f] }
 0x227   : > { %v938_v56 = vmax.f32 %v2030_v52, 0.0  ;;  %v976_v58 = vmul.f32 %v2705_v27, %v935_v22 }
 0x228   : > { %v939_v57 = vmax.f32 %v2031_v55, 0.0  ;;  %1012 = vrot.lane.b32.xlu1 %v988_v13, %s2310_s12  ;;  %v977_v59 = vmul.f32 %v2707_v34, %v936_v54 }
 0x229   : > { %v979_v10 = vmul.f32 %v2705_v27, %v938_v56  ;;  %1018 = vrot.lane.b32.xlu0 %v991_v48, %s2310_s12 }
 0x22a   : > { %v980_v60 = vmul.f32 %v2707_v34, %v939_v57  ;;  %v784_v61 = vpop.f32.mrb[12].mxu0 }
 0x22b   : > { %v2032_v62 = vadd.f32 %v784_v61, %v2700_v18  ;;  %v786_v63 = vpop.f32.mrb[13].mxu0  ;;  %v994_v0 = vpack.c.bf16 %v979_v10, %v976_v58 }
 0x22c   : > { %v2033_v15 = vadd.f32 %v786_v63, %v2700_v18  ;;  %v788_v2 = vpop.f32.mrb[14].mxu0  ;;  %1014 = vrot.lane.b32.xlu1 %v989_v21, %s2310_s12  ;;  %v995_v3 = vpack.c.bf16 %v980_v60, %v977_v59 }
 0x22d   : > { %v941_v5 = vmax.f32 %v2032_v62, 0.0  ;;  %v2034_v6 = vadd.f32 %v788_v2, %v2709_v38  ;;  %v790_v9 = vpop.f32.mrb[15].mxu0  ;;  %1020 = vrot.lane.b32.xlu0 %v992_v51, %s2310_s12  ;;  %v1446_v51 = vunpack.c.l.s4 %v2311_v50 }
 0x22e   : > { %v942_v11 = vmax.f32 %v2033_v15, 0.0  ;;  %v2035_v12 = vadd.f32 %v790_v9, %v2709_v38 }
 0x22f   : > { %v944_v13 = vmax.f32 %v2034_v6, 0.0  ;;  %v982_v16 = vmul.f32 %v2705_v27, %v941_v5  ;;  %v1447_v22 = vunpack.c.0.s8 %v1446_v51 }
 0x230   : > { %v945_v14 = vmax.f32 %v2035_v12, 0.0  ;;  %1024 = vrot.lane.b32.xlu1 %v994_v0, %s2310_s12  ;;  %v983_v17 = vmul.f32 %v2707_v34, %v942_v11 }
 0x231   : > { %v985_v18 = vmul.f32 %v2705_v27, %v944_v13  ;;  %v2923_v52 = vsub.s32 %v1447_v22, %v2685_v4 }
 0x232   : > { %v986_v19 = vmul.f32 %v2707_v34, %v945_v14 }
 0x233   : > { %v997_v20 = vpack.c.bf16 %v985_v18, %v982_v16  ;;  %v2936_v54 = vrot.slane %v2930_v53, %v2923_v52 }
 0x234   : > { %1026 = vrot.lane.b32.xlu1 %v995_v3, %s2310_s12  ;;  %v998_v21 = vpack.c.bf16 %v986_v19, %v983_v17 }
 0x235   : > { %1030 = vrot.lane.b32.xlu0 %v997_v20, %s2310_s12  ;;  %v1459_v55 = vcombine.high %v2936_v54, %v2936_v54 }
 0x237   : > { %v2945_v56 = vrot.slane %v1459_v55, %v2923_v52 }
 0x239   : > { %1032 = vrot.lane.b32.xlu0 %v998_v21, %s2310_s12  ;;  %1646 = vmatprep.mubr.bf16.mxu0 %v2945_v56  ;;  %s1761_s12 = scalar_lea.sflag [#allocation4], %s2496_s15 }
 0x23a   : > { %1523 = vmatprep.mubr.bf16.mxu1 %v2945_v56 }
 0x28e   : > { %v1023_v38 = vpop.permute.xlu1 %1022 }
 0x28f   : > { %v1017_v23 = vpop.permute.xlu0 %1016 }
 0x296   : > { %v2772_v24 = vpop.permute.xlu1 %1034 }
 0x297   : > { %v1029_v25 = vpop.permute.xlu0 %1028 }
 0x29a   : > { %v1013_v26 = vpop.permute.xlu1 %1012 }
 0x29b   : > { %v2775_v27 = vsel %vm1036_vm9, 0, %v1013_v26  ;;  %v1019_v28 = vpop.permute.xlu0 %1018 }
 0x29c   : > { %1084 = vrot.lane.b32.xlu1 %v2775_v27, %s2301_s29  ;;  %v2829_v42 = vsel %vm1036_vm9, 0, %v1019_v28 }
 0x29e   : > { %v1015_v34 = vpop.permute.xlu1 %1014 }
 0x29f   : > { %v2785_v30 = vsel %vm1036_vm9, %v1013_v26, %v1015_v34  ;;  %v1038_v1 = vsel %vm1036_vm9, %v1015_v34, %v1017_v23  ;;  %v1021_v31 = vpop.permute.xlu0 %1020 }
 0x2a0   : > { %v2789_v32 = vsel %vm1063_vm10, %v1038_v1, 0  ;;  %v2792_v33 = vsel %vm1036_vm9, %v1019_v28, %v1021_v31  ;;  %1128 = vrot.lane.b32.xlu1 %v2775_v27, %s2302_s27  ;;  %1491 = vmatprep.subr.bf16.mxu1 %v2785_v30  ;;  %v1040_v43 = vsel %vm1036_vm9, %v1021_v31, %v1023_v38 }
 0x2a1   : > { %1088 = vrot.lane.b32.xlu0 %v2789_v32, %s2301_s29  ;;  %1889 = vmatpush1.bf16.msk.msra.mxu1 %vm2780_vm11, %v1013_v26  ;;  %v2845_v8 = vsel %vm1063_vm10, %v1040_v43, 0 }
 0x2a2   : > { %1493 = vmatprep.subr.bf16.mxu1 %v2792_v33  ;;  %v1025_v35 = vpop.permute.xlu1 %1024 }
 0x2a3   : > { %v2864_v44 = vsel %vm1036_vm9, 0, %v1025_v35 }
 0x2a4   : > { %1172 = vrot.lane.b32.xlu1 %v2775_v27, %s2303_s17 }
 0x2a5   : > { %1132 = vrot.lane.b32.xlu0 %v2789_v32, %s2302_s27  ;;  %1891 = vmatpush1.bf16.msk.msra.mxu1 %vm2780_vm11, %v1019_v28 }
 0x2a6   : > { %v1027_v36 = vpop.permute.xlu1 %1026 }
 0x2a7   : > { %v2809_v37 = vsel %vm1036_vm9, %v1025_v35, %v1027_v36  ;;  %v1031_v39 = vpop.permute.xlu0 %1030  ;;  %v1042_v45 = vsel %vm1036_vm9, %v1027_v36, %v1029_v25 }
 0x2a8   : > { %1216 = vrot.lane.b32.xlu1 %v2775_v27, %s2304_s10  ;;  %1495 = vmatprep.subr.bf16.mxu1 %v2809_v37  ;;  %v2872_v46 = vsel %vm1063_vm10, %v1042_v45, 0  ;;  %v2887_v47 = vsel %vm1036_vm9, 0, %v1031_v39 }
 0x2a9   : > { %1176 = vrot.lane.b32.xlu0 %v2789_v32, %s2303_s17  ;;  %1893 = vmatpush1.bf16.msk.msra.mxu1 %vm2780_vm11, %v1025_v35 }
 0x2ab   : > { %v1033_v40 = vpop.permute.xlu0 %1032 }
 0x2ac   : > { %v2819_v41 = vsel %vm1036_vm9, %v1031_v39, %v1033_v40  ;;  %1086 = vrot.lane.b32.xlu1 %v2785_v30, %s2301_s29  ;;  %v1044_v48 = vsel %vm1036_vm9, %v1033_v40, %v2772_v24 }
 0x2ad   : > { %1220 = vrot.lane.b32.xlu0 %v2789_v32, %s2304_s10  ;;  %1497 = vmatprep.subr.bf16.mxu1 %v2819_v41  ;;  %v2904_v49 = vsel %vm1063_vm10, %v1044_v48, 0 }
 0x2ae   : > { %1895 = vmatpush1.bf16.msk.msra.mxu1 %vm2780_vm11, %v1031_v39 }
 0x2b0   : > { %1130 = vrot.lane.b32.xlu1 %v2785_v30, %s2302_s27 }
 0x2b1   : > { %1090 = vrot.lane.b32.xlu0 %v2829_v42, %s2301_s29 }
 0x2b4   : > { %1174 = vrot.lane.b32.xlu1 %v2785_v30, %s2303_s17 }
 0x2b5   : > { %1134 = vrot.lane.b32.xlu0 %v2829_v42, %s2302_s27 }
 0x2b8   : > { %1218 = vrot.lane.b32.xlu1 %v2785_v30, %s2304_s10 }
 0x2b9   : > { %1178 = vrot.lane.b32.xlu0 %v2829_v42, %s2303_s17 }
 0x2bc   : > { %1094 = vrot.lane.b32.xlu1 %v2845_v8, %s2301_s29 }
 0x2bd   : > { %1222 = vrot.lane.b32.xlu0 %v2829_v42, %s2304_s10 }
 0x2c0   : > { %1138 = vrot.lane.b32.xlu1 %v2845_v8, %s2302_s27 }
 0x2c1   : > { %1092 = vrot.lane.b32.xlu0 %v2792_v33, %s2301_s29 }
 0x2c4   : > { %1182 = vrot.lane.b32.xlu1 %v2845_v8, %s2303_s17 }
 0x2c5   : > { %1136 = vrot.lane.b32.xlu0 %v2792_v33, %s2302_s27 }
 0x2c8   : > { %1226 = vrot.lane.b32.xlu1 %v2845_v8, %s2304_s10 }
 0x2c9   : > { %1180 = vrot.lane.b32.xlu0 %v2792_v33, %s2303_s17 }
 0x2cc   : > { %1096 = vrot.lane.b32.xlu1 %v2864_v44, %s2301_s29 }
 0x2cd   : > { %1224 = vrot.lane.b32.xlu0 %v2792_v33, %s2304_s10 }
 0x2d0   : > { %1140 = vrot.lane.b32.xlu1 %v2864_v44, %s2302_s27 }
 0x2d1   : > { %1100 = vrot.lane.b32.xlu0 %v2872_v46, %s2301_s29 }
 0x2d4   : > { %1184 = vrot.lane.b32.xlu1 %v2864_v44, %s2303_s17 }
 0x2d5   : > { %1144 = vrot.lane.b32.xlu0 %v2872_v46, %s2302_s27 }
 0x2d8   : > { %1098 = vrot.lane.b32.xlu1 %v2809_v37, %s2301_s29 }
 0x2d9   : > { %1188 = vrot.lane.b32.xlu0 %v2872_v46, %s2303_s17 }
 0x2dc   : > { %1142 = vrot.lane.b32.xlu1 %v2809_v37, %s2302_s27 }
 0x2dd   : > { %1102 = vrot.lane.b32.xlu0 %v2887_v47, %s2301_s29 }
 0x2e0   : > { %1186 = vrot.lane.b32.xlu1 %v2809_v37, %s2303_s17 }
 0x2e1   : > { %1146 = vrot.lane.b32.xlu0 %v2887_v47, %s2302_s27 }
 0x2e4   : > { %1230 = vrot.lane.b32.xlu1 %v2809_v37, %s2304_s10 }
 0x2e5   : > { %1190 = vrot.lane.b32.xlu0 %v2887_v47, %s2303_s17 }
 0x2e8   : > { %1106 = vrot.lane.b32.xlu1 %v2904_v49, %s2301_s29 }
 0x2e9   : > { %1104 = vrot.lane.b32.xlu0 %v2819_v41, %s2301_s29 }
 0x2ec   : > { %1228 = vrot.lane.b32.xlu1 %v2864_v44, %s2304_s10 }
 0x2ed   : > { %1232 = vrot.lane.b32.xlu0 %v2872_v46, %s2304_s10 }
 0x2f0   : > { %1262 = vrot.lane.b32.xlu1 %v2785_v30, %s2305_s19 }
 0x2f1   : > { %1148 = vrot.lane.b32.xlu0 %v2819_v41, %s2302_s27 }
 0x2f4   : > { %1260 = vrot.lane.b32.xlu1 %v2775_v27, %s2305_s19 }
 0x2f5   : > { %1192 = vrot.lane.b32.xlu0 %v2819_v41, %s2303_s17 }
 0x2f8   : > { %1150 = vrot.lane.b32.xlu1 %v2904_v49, %s2302_s27  ;;  %s3339_s27 = smov 91  }
 0x2f9   : > { %1236 = vrot.lane.b32.xlu0 %v2819_v41, %s2304_s10 }
 0x2fc   : > { %1270 = vrot.lane.b32.xlu1 %v2845_v8, %s2305_s19 }
 0x2fd   : > { %1234 = vrot.lane.b32.xlu0 %v2887_v47, %s2304_s10 }
 0x300   : > { %1274 = vrot.lane.b32.xlu1 %v2809_v37, %s2305_s19 }
 0x301   : > { %1264 = vrot.lane.b32.xlu0 %v2789_v32, %s2305_s19 }
 0x304   : > { %1272 = vrot.lane.b32.xlu1 %v2864_v44, %s2305_s19 }
 0x305   : > { %1268 = vrot.lane.b32.xlu0 %v2792_v33, %s2305_s19 }
 0x308   : > { %1194 = vrot.lane.b32.xlu1 %v2904_v49, %s2303_s17  ;;  %s3340_s17 = smov 90  }
 0x309   : > { %1266 = vrot.lane.b32.xlu0 %v2829_v42, %s2305_s19 }
 0x30c   : > { %1306 = vrot.lane.b32.xlu1 %v2785_v30, %s2306_s30 }
 0x30d   : > { %1276 = vrot.lane.b32.xlu0 %v2872_v46, %s2305_s19 }
 0x30e   : > { %v1085_v57 = vpop.permute.xlu1 %1084 }
 0x310   : > { %1304 = vrot.lane.b32.xlu1 %v2775_v27, %s2306_s30 }
 0x311   : > { %1280 = vrot.lane.b32.xlu0 %v2819_v41, %s2305_s19 }
 0x312   : > { %v2969_v58 = vpop.permute.xlu1 %1128 }
 0x313   : > { %v2971_v10 = vpop.permute.xlu0 %1088 }
 0x314   : > { %1314 = vrot.lane.b32.xlu1 %v2845_v8, %s2306_s30 }
 0x315   : > { %1278 = vrot.lane.b32.xlu0 %v2887_v47, %s2305_s19 }
 0x316   : > { %v1173_v59 = vpop.permute.xlu1 %1172 }
 0x317   : > { %v2977_v60 = vpop.permute.xlu0 %1132 }
 0x318   : > { %1947 = vmatprep.subr.bf16.mxu0 %v2977_v60  ;;  %1238 = vrot.lane.b32.xlu1 %v2904_v49, %s2304_s10 }
 0x319   : > { %1948 = vmatpush3.bf16.msra.mxu0 %v2789_v32  ;;  %1308 = vrot.lane.b32.xlu0 %v2789_v32, %s2306_s30 }
 0x31a   : > { %v1217_v61 = vpop.permute.xlu1 %1216 }
 0x31b   : > { %v2985_v62 = vpop.permute.xlu0 %1176 }
 0x31c   : > { %1318 = vrot.lane.b32.xlu1 %v2809_v37, %s2306_s30 }
 0x31d   : > { %1312 = vrot.lane.b32.xlu0 %v2792_v33, %s2306_s30 }
 0x31e   : > { %v1087_v63 = vpop.permute.xlu1 %1086 }
 0x31f   : > { %v1108_v0 = vsel %vm338_vm0, %v1085_v57, %v1087_v63  ;;  %v2992_v15 = vpop.permute.xlu0 %1220  ;;  %v1109_v2 = vsel %vm338_vm0, %v1087_v63, %v2971_v10 }
 0x320   : > { %1316 = vrot.lane.b32.xlu1 %v2864_v44, %s2306_s30  ;;  %1499 = vmatprep.subr.bf16.mxu1 %v1109_v2 }
 0x321   : > { %1310 = vrot.lane.b32.xlu0 %v2829_v42, %s2306_s30  ;;  %1500 = vmatpush1.bf16.msra.mxu1 %v1108_v0 }
 0x322   : > { %v3000_v3 = vpop.permute.xlu1 %1130 }
 0x323   : > { %v1091_v5 = vpop.permute.xlu0 %1090  ;;  %v1152_v22 = vsel %vm361_vm1, %v2969_v58, %v3000_v3 }
 0x324   : > { %1350 = vrot.lane.b32.xlu1 %v2785_v30, %s3339_s27 }
 0x325   : > { %1320 = vrot.lane.b32.xlu0 %v2872_v46, %s2306_s30 }
 0x326   : > { %v3006_v6 = vpop.permute.xlu1 %1174 }
 0x327   : > { %v3010_v9 = vsel %vm384_vm2, %v1173_v59, %v3006_v6  ;;  %v3012_v11 = vpop.permute.xlu0 %1134 }
 0x328   : > { %1282 = vrot.lane.b32.xlu1 %v2904_v49, %s2305_s19 }
 0x329   : > { %1324 = vrot.lane.b32.xlu0 %v2819_v41, %s2306_s30 }
 0x32a   : > { %v3018_v12 = vpop.permute.xlu1 %1218 }
 0x32b   : > { %v3022_v13 = vsel %vm407_vm3, %v1217_v61, %v3018_v12  ;;  %v3024_v14 = vpop.permute.xlu0 %1178 }
 0x32c   : > { %1348 = vrot.lane.b32.xlu1 %v2775_v27, %s3339_s27 }
 0x32d   : > { %1322 = vrot.lane.b32.xlu0 %v2887_v47, %s2306_s30 }
 0x32e   : > { %v3030_v16 = vpop.permute.xlu1 %1094 }
 0x32f   : > { %v1223_v18 = vpop.permute.xlu0 %1222 }
 0x330   : > { %1358 = vrot.lane.b32.xlu1 %v2845_v8, %s3339_s27 }
 0x331   : > { %1352 = vrot.lane.b32.xlu0 %v2789_v32, %s3339_s27 }
 0x332   : > { %v3036_v17 = vpop.permute.xlu1 %1138 }
 0x333   : > { %v1093_v19 = vpop.permute.xlu0 %1092  ;;  %1949 = vmatprep.subr.bf16.mxu0 %v3036_v17 }
 0x334   : > { %v1110_v20 = vsel %vm338_vm0, %v1091_v5, %v1093_v19  ;;  %1362 = vrot.lane.b32.xlu1 %v2809_v37, %s3339_s27  ;;  %1950 = vmatpush3.bf16.msra.mxu0 %v2845_v8  ;;  %v1111_v21 = vsel %vm338_vm0, %v1093_v19, %v3030_v16 }
 0x335   : > { %1356 = vrot.lane.b32.xlu0 %v2792_v33, %s3339_s27  ;;  %1501 = vmatprep.subr.bf16.mxu1 %v1111_v21 }
 0x336   : > { %1502 = vmatpush1.bf16.msra.mxu1 %v1110_v20  ;;  %v3047_v38 = vpop.permute.xlu1 %1182 }
 0x337   : > { %v1137_v23 = vpop.permute.xlu0 %1136 }
 0x338   : > { %1326 = vrot.lane.b32.xlu1 %v2904_v49, %s2306_s30  ;;  %v1154_v59 = vsel %vm361_vm1, %v3012_v11, %v1137_v23  ;;  %s2065_s30 = smul.u32 6, %s2496_s15 }
 0x339   : > { %1354 = vrot.lane.b32.xlu0 %v2829_v42, %s3339_s27 }
 0x33a   : > { %v3053_v24 = vpop.permute.xlu1 %1226  ;;  %s284_s18 = scalar_lea.vmem [#allocation7], %s2065_s30 }
 0x33b   : > { %v3055_v25 = vpop.permute.xlu0 %1180  ;;  %s1775_s11 = sshll.u32 %s284_s18, 4  ;;  %s3266_s11 = int_to_ptr.vmem [resolvable:$true] %s1775_s11 }
 0x33c   : > { %1360 = vrot.lane.b32.xlu1 %v2864_v44, %s3339_s27  ;;  %v1199_v19 = vsel %vm384_vm2, %v3055_v25, %v3047_v38  ;;  %s2225_s29 = scalar_lea.vmem %s3266_s11, 96  ;;  %p2232_p10 = scmp.lt.s32.totalorder %s3266_s11, %s2230_s7 }
 0x33d   : > { %1364 = vrot.lane.b32.xlu0 %v2872_v46, %s3339_s27  ;;  %p2226_p4 = scmp.ne.s32.totalorder %s3266_s11, %s2225_s29 }
 0x33e   : > { %v1097_v26 = vpop.permute.xlu1 %1096 }
 0x33f   : > { %v3061_v28 = vpop.permute.xlu0 %1224  ;;  %p2227_p6 = pnand %p2226_p4, %p2445_p12 }
 0x340   : > { %v3065_v34 = vsel %vm407_vm3, %v1223_v18, %v3061_v28  ;;  %1394 = vrot.lane.b32.xlu1 %v2785_v30, %s3340_s17  ;;  %v1197_v18 = vsel %vm384_vm2, %v3006_v6, %v2985_v62 }
 0x341   : > { %1368 = vrot.lane.b32.xlu0 %v2819_v41, %s3339_s27  ;;  %p2228_p8 = pneg %p2227_p6 }
 0x342   : > { %v1141_v29 = vpop.permute.xlu1 %1140 }
 0x343   : > { %v3071_v1 = vpop.permute.xlu0 %1100 }
 0x344   : > { %1392 = vrot.lane.b32.xlu1 %v2775_v27, %s3340_s17 }
 0x345   : > { %1366 = vrot.lane.b32.xlu0 %v2887_v47, %s3339_s27 }
 0x346   : > { %v3077_v31 = vpop.permute.xlu1 %1184 }
 0x347   : > { %v1145_v35 = vpop.permute.xlu0 %1144 }
 0x348   : > { %1370 = vrot.lane.b32.xlu1 %v2904_v49, %s3339_s27  ;;  %1951 = vmatprep.subr.bf16.mxu0 %v1145_v35  ;;  %s2231_s27 = scalar_lea.vmem %s2230_s7, 192 }
 0x349   : > { %1396 = vrot.lane.b32.xlu0 %v2789_v32, %s3340_s17  ;;  %1952 = vmatpush3.bf16.msra.mxu0 %v2872_v46  ;;  %p2233_p11 = scmp.lt.s32.totalorder %s2231_s27, %s2225_s29 }
 0x34a   : > { %v1099_v30 = vpop.permute.xlu1 %1098 }
 0x34b   : > { %v1112_v36 = vsel %vm338_vm0, %v1097_v26, %v1099_v30  ;;  %v3085_v39 = vpop.permute.xlu0 %1188  ;;  %v1113_v27 = vsel %vm338_vm0, %v1099_v30, %v3071_v1  ;;  %p2234_p3 = por %p2233_p11, %p2232_p10 }
 0x34c   : > { %1402 = vrot.lane.b32.xlu1 %v2845_v8, %s3340_s17  ;;  %1503 = vmatprep.subr.bf16.mxu1 %v1113_v27 }
 0x34d   : > { %1400 = vrot.lane.b32.xlu0 %v2792_v33, %s3340_s17  ;;  %1504 = vmatpush1.bf16.msra.mxu1 %v1112_v36  ;;  %p2235_p7 = pnand %p2234_p3, %p2228_p8 }
 0x34e   : > { %v1143_v40 = vpop.permute.xlu1 %1142 }
 0x34f   : > { %v1103_v32 = vpop.permute.xlu0 %1102  ;;  %v1157_v61 = vsel %vm361_vm1, %v1143_v40, %v1145_v35  ;;  %v1156_v58 = vsel %vm361_vm1, %v1141_v29, %v1143_v40 }
 0x350   : > { %1406 = vrot.lane.b32.xlu1 %v2809_v37, %s3340_s17  ;;  %v1437_v37 = vld [vmem:[%s3312_s4] sm:$0x3] }
 0x351   : > { %1398 = vrot.lane.b32.xlu0 %v2829_v42, %s3340_s17 }
 0x352   : > { %v3097_v43 = vpop.permute.xlu1 %1186 }
 0x353   : > { %v1147_v45 = vpop.permute.xlu0 %1146  ;;  %v1201_v6 = vsel %vm384_vm2, %v3097_v43, %v3085_v39 }
 0x354   : > { %1404 = vrot.lane.b32.xlu1 %v2864_v44, %s3340_s17 }
 0x355   : > { %1408 = vrot.lane.b32.xlu0 %v2872_v46, %s3340_s17 }
 0x356   : > { %v3103_v8 = vpop.permute.xlu1 %1230 }
 0x357   : > { %v3105_v33 = vpop.permute.xlu0 %1190 }
 0x358   : > { %1414 = vrot.lane.b32.xlu1 %v2904_v49, %s3340_s17 }
 0x359   : > { %1412 = vrot.lane.b32.xlu0 %v2819_v41, %s3340_s17  ;;  %v1153_v41 = vsel %vm361_vm1, %v3000_v3, %v2977_v60 }
 0x35a   : > { %v1107_v42 = vpop.permute.xlu1 %1106 }
 0x35b   : > { %v1105_v48 = vpop.permute.xlu0 %1104 }
 0x35c   : > { %v1114_v44 = vsel %vm338_vm0, %v1103_v32, %v1105_v48  ;;  %1440 = vperm.xlu1 %2141, %v1437_v37   ;;  %v1115_v46 = vsel %vm338_vm0, %v1105_v48, %v1107_v42  ;;  %vm1756_vm0 = vmor %vm1755_vm15, %vm1754_vm14 }
 0x35d   : > { %1410 = vrot.lane.b32.xlu0 %v2887_v47, %s3340_s17  ;;  %1505 = vmatprep.subr.bf16.mxu1 %v1115_v46  ;;  %v1155_v47 = vsel %vm361_vm1, %v1137_v23, %v3036_v17  ;;  %v3176_v23 = vrot.slane %v2936_v54, %v2923_v52 }
 0x35e   : > { %1506 = vmatpush1.bf16.msra.mxu1 %v1114_v44  ;;  %v3118_v50 = vpop.permute.xlu1 %1228 }
 0x35f   : > { %v3123_v51 = vpop.permute.xlu0 %1232  ;;  %1507 = vmatprep.subr.bf16.mxu1 %v1153_v41 }
 0x360   : > { %v1245_v30 = vsel %vm407_vm3, %v3103_v8, %v3123_v51 }
 0x362   : > { %1508 = vmatpush1.bf16.msra.mxu1 %v1152_v22  ;;  %v3128_v55 = vpop.permute.xlu1 %1262 }
 0x363   : > { %v1149_v57 = vpop.permute.xlu0 %1148  ;;  %1509 = vmatprep.subr.bf16.mxu1 %v1155_v47 }
 0x364   : > { %v1158_v5 = vsel %vm361_vm1, %v1147_v45, %v1149_v57 }
 0x366   : > { %1510 = vmatpush1.bf16.msra.mxu1 %v1154_v59  ;;  %v3134_v60 = vpop.permute.xlu1 %1260 }
 0x367   : > { %v1193_v63 = vpop.permute.xlu0 %1192  ;;  %1511 = vmatprep.subr.bf16.mxu1 %v1157_v61  ;;  %v1284_v45 = vsel %vm430_vm4, %v3134_v60, %v3128_v55 }
 0x368   : > { %v1202_v26 = vsel %vm384_vm2, %v3105_v33, %v1193_v63 }
 0x36a   : > { %1512 = vmatpush1.bf16.msra.mxu1 %v1156_v58  ;;  %v1151_v0 = vpop.permute.xlu1 %1150 }
 0x36b   : > { %v3138_v2 = vpop.permute.xlu0 %1236  ;;  %1953 = vmatprep.subr.bf16.mxu0 %v1151_v0  ;;  %v1159_v3 = vsel %vm361_vm1, %v1149_v57, %v1151_v0  ;;  %vm1757_vm1 = vcmask 259076  }
 0x36c   : > { %1513 = vmatprep.subr.bf16.mxu1 %v1159_v3  ;;  %1954 = vmatpush3.bf16.msra.mxu0 %v2904_v49 }
 0x36d   : > { %1955 = vmatprep.subr.bf16.mxu0 %v2985_v62  ;;  %v1198_v62 = vsel %vm384_vm2, %v3024_v14, %v3055_v25  ;;  %v1482_v25 = vcombine.high %v2945_v56, %v2945_v56  ;;  %v1243_v56 = vsel %vm407_vm3, %v3061_v28, %v3053_v24 }
 0x36e   : > { %1514 = vmatpush1.bf16.msra.mxu1 %v1158_v5  ;;  %v3144_v11 = vpop.permute.xlu1 %1270 }
 0x36f   : > { %v1235_v17 = vpop.permute.xlu0 %1234  ;;  %1515 = vmatprep.subr.bf16.mxu1 %v1197_v18 }
 0x370   : > { %1956 = vmatpush3.bf16.msra.mxu0 %v2971_v10 }
 0x371   : > { %1957 = vmatprep.subr.bf16.mxu0 %v3047_v38 }
 0x372   : > { %1516 = vmatpush1.bf16.msra.mxu1 %v3010_v9  ;;  %v3152_v49 = vpop.permute.xlu1 %1274 }
 0x373   : > { %v3157_v20 = vpop.permute.xlu0 %1264  ;;  %1517 = vmatprep.subr.bf16.mxu1 %v1199_v19 }
 0x374   : > { %1958 = vmatpush3.bf16.msra.mxu0 %v3030_v16  ;;  %v1200_v16 = vsel %vm384_vm2, %v3077_v31, %v3097_v43  ;;  %v1285_v32 = vsel %vm430_vm4, %v3128_v55, %v3157_v20 }
 0x375   : > { %1959 = vmatprep.subr.bf16.mxu0 %v3085_v39 }
 0x376   : > { %1518 = vmatpush1.bf16.msra.mxu1 %v1198_v62  ;;  %v3164_v10 = vpop.permute.xlu1 %1272 }
 0x377   : > { %v1269_v9 = vpop.permute.xlu0 %1268  ;;  %1519 = vmatprep.subr.bf16.mxu1 %v1201_v6 }
 0x378   : > { %1960 = vmatpush3.bf16.msra.mxu0 %v3071_v1  ;;  %v1241_v1 = vsel %vm407_vm3, %v3018_v12, %v2992_v15 }
 0x37a   : > { %1520 = vmatpush1.bf16.msra.mxu1 %v1200_v16  ;;  %v1195_v21 = vpop.permute.xlu1 %1194 }
 0x37b   : > { %v1267_v14 = vpop.permute.xlu0 %1266  ;;  %1961 = vmatprep.subr.bf16.mxu0 %v1195_v21  ;;  %v1203_v38 = vsel %vm384_vm2, %v1193_v63, %v1195_v21  ;;  %vm1758_vm2 = vmor %vm1757_vm1, %vm1756_vm0 }
 0x37c   : > { %1521 = vmatprep.subr.bf16.mxu1 %v1203_v38  ;;  %1962 = vmatpush3.bf16.msra.mxu0 %v1107_v42  ;;  %v1286_v37 = vsel %vm430_vm4, %v1267_v14, %v1269_v9 }
 0x37e   : > { %1522 = vmatpush1.bf16.msra.mxu1 %v1202_v26  ;;  %v1307_v29 = vpop.permute.xlu1 %1306 }
 0x37f   : > { %v3185_v31 = vpop.permute.xlu0 %1276  ;;  %1532 = vmatprep.subr.bf16.mxu1 %v1241_v1  ;;  %1647 = vmatmul.mubr.bf16.vlgmr.msra.gmra.mrb[16].mxu0 %v3176_v23 }
 0x380   : > { %1686 = vmatprep.mubr.bf16.mxu0 %v1482_v25  ;;  %v1289_v48 = vsel %vm430_vm4, %v3152_v49, %v3185_v31 }
 0x381   : > { %1524 = vmatmul.mubr.bf16.vlgmr.msra.gmra.mrb[24].mxu1 %v3176_v23 }
 0x382   : > { %1533 = vmatpush1.bf16.msra.mxu1 %v3022_v13  ;;  %v1305_v54 = vpop.permute.xlu1 %1304  ;;  %1564 = vmatprep.mubr.bf16.mxu1 %v1482_v25  ;;  %v1244_v13 = vsel %vm407_vm3, %v3118_v50, %v3103_v8 }
 0x383   : > { %v1281_v35 = vpop.permute.xlu0 %1280  ;;  %1534 = vmatprep.subr.bf16.mxu1 %v1243_v56  ;;  %v1328_v59 = vsel %vm453_vm5, %v1305_v54, %v1307_v29 }
 0x386   : > { %1535 = vmatpush1.bf16.msra.mxu1 %v3065_v34  ;;  %v1315_v12 = vpop.permute.xlu1 %1314  ;;  %v1246_v34 = vsel %vm407_vm3, %v1235_v17, %v3138_v2 }
 0x387   : > { %v1279_v36 = vpop.permute.xlu0 %1278  ;;  %1536 = vmatprep.subr.bf16.mxu1 %v1245_v30 }
 0x388   : > { %v1290_v22 = vsel %vm430_vm4, %v1279_v36, %v1281_v35 }
 0x38a   : > { %1537 = vmatpush1.bf16.msra.mxu1 %v1244_v13  ;;  %v1239_v39 = vpop.permute.xlu1 %1238 }
 0x38b   : > { %v1309_v27 = vpop.permute.xlu0 %1308  ;;  %v1247_v28 = vsel %vm407_vm3, %v3138_v2, %v1239_v39 }
 0x38c   : > { %1538 = vmatprep.subr.bf16.mxu1 %v1247_v28  ;;  %1969 = vmatprep.subr.bf16.mxu0 %v1309_v27  ;;  %v1329_v47 = vsel %vm453_vm5, %v1307_v29, %v1309_v27 }
 0x38d   : > { %1970 = vmatpush3.bf16.msra.mxu0 %v2992_v15  ;;  %v1287_v15 = vsel %vm430_vm4, %v1269_v9, %v3144_v11 }
 0x38e   : > { %1539 = vmatpush1.bf16.msra.mxu1 %v1246_v34  ;;  %1971 = vmatprep.subr.bf16.mxu0 %v1315_v12  ;;  %v1319_v40 = vpop.permute.xlu1 %1318 }
 0x38f   : > { %v1313_v43 = vpop.permute.xlu0 %1312  ;;  %1540 = vmatprep.subr.bf16.mxu1 %v1285_v32 }
 0x391   : > { %1972 = vmatpush3.bf16.msra.mxu0 %v3053_v24  ;;  %v1288_v24 = vsel %vm430_vm4, %v3164_v10, %v3152_v49 }
 0x392   : > { %1541 = vmatpush1.bf16.msra.mxu1 %v1284_v45  ;;  %v1317_v8 = vpop.permute.xlu1 %1316 }
 0x393   : > { %v1311_v33 = vpop.permute.xlu0 %1310  ;;  %1542 = vmatprep.subr.bf16.mxu1 %v1287_v15  ;;  %v1332_v3 = vsel %vm453_vm5, %v1317_v8, %v1319_v40 }
 0x394   : > { %v1330_v63 = vsel %vm453_vm5, %v1311_v33, %v1313_v43 }
 0x396   : > { %1543 = vmatpush1.bf16.msra.mxu1 %v1286_v37  ;;  %v1351_v42 = vpop.permute.xlu1 %1350 }
 0x397   : > { %v1321_v44 = vpop.permute.xlu0 %1320  ;;  %1544 = vmatprep.subr.bf16.mxu1 %v1289_v48 }
 0x398   : > { %1973 = vmatprep.subr.bf16.mxu0 %v1321_v44  ;;  %v1333_v0 = vsel %vm453_vm5, %v1319_v40, %v1321_v44 }
 0x399   : > { %1974 = vmatpush3.bf16.msra.mxu0 %v3123_v51  ;;  %v1331_v51 = vsel %vm453_vm5, %v1313_v43, %v1315_v12 }
 0x39a   : > { %1545 = vmatpush1.bf16.msra.mxu1 %v1288_v24  ;;  %v1283_v46 = vpop.permute.xlu1 %1282 }
 0x39b   : > { %v1325_v50 = vpop.permute.xlu0 %1324  ;;  %v1291_v41 = vsel %vm430_vm4, %v1281_v35, %v1283_v46  ;;  %v2312_v35 = vmov 0.0  }
 0x39c   : > { %1546 = vmatprep.subr.bf16.mxu1 %v1291_v41 }
 0x39e   : > { %1547 = vmatpush1.bf16.msra.mxu1 %v1290_v22  ;;  %v1349_v55 = vpop.permute.xlu1 %1348 }
 0x39f   : > { %v1323_v57 = vpop.permute.xlu0 %1322  ;;  %1548 = vmatprep.subr.bf16.mxu1 %v1329_v47  ;;  %v1372_v6 = vsel %vm476_vm6, %v1349_v55, %v1351_v42 }
 0x3a0   : > { %v1334_v49 = vsel %vm453_vm5, %v1323_v57, %v1325_v50 }
 0x3a2   : > { %1549 = vmatpush1.bf16.msra.mxu1 %v1328_v59  ;;  %v1359_v60 = vpop.permute.xlu1 %1358 }
 0x3a3   : > { %v1353_v61 = vpop.permute.xlu0 %1352  ;;  %1550 = vmatprep.subr.bf16.mxu1 %v1331_v51 }
 0x3a4   : > { %v1373_v62 = vsel %vm476_vm6, %v1351_v42, %v1353_v61 }
 0x3a6   : > { %1551 = vmatpush1.bf16.msra.mxu1 %v1330_v63  ;;  %v1363_v58 = vpop.permute.xlu1 %1362 }
 0x3a7   : > { %v1357_v2 = vpop.permute.xlu0 %1356  ;;  %1552 = vmatprep.subr.bf16.mxu1 %v1333_v0 }
 0x3a8   : > { %v1375_v16 = vsel %vm476_vm6, %v1357_v2, %v1359_v60 }
 0x3aa   : > { %1553 = vmatpush1.bf16.msra.mxu1 %v1332_v3  ;;  %v1327_v5 = vpop.permute.xlu1 %1326 }
 0x3ab   : > { %v1355_v18 = vpop.permute.xlu0 %1354  ;;  %1975 = vmatprep.subr.bf16.mxu0 %v1327_v5  ;;  %v1335_v17 = vsel %vm453_vm5, %v1325_v50, %v1327_v5 }
 0x3ac   : > { %1554 = vmatprep.subr.bf16.mxu1 %v1335_v17  ;;  %1976 = vmatpush3.bf16.msra.mxu0 %v1239_v39  ;;  %v1374_v14 = vsel %vm476_vm6, %v1355_v18, %v1357_v2  ;;  %v1444_v39 = vcombine.high %v2930_v53, %v2930_v53 }
 0x3ad   : > { %1977 = vmatprep.subr.bf16.mxu0 %v1353_v61 }
 0x3ae   : > { %1555 = vmatpush1.bf16.msra.mxu1 %v1334_v49  ;;  %v1361_v19 = vpop.permute.xlu1 %1360  ;;  %v1458_v40 = vrot.slane %v1444_v39, %v2923_v52 }
 0x3af   : > { %v1365_v10 = vpop.permute.xlu0 %1364  ;;  %1556 = vmatprep.subr.bf16.mxu1 %v1373_v62 }
 0x3b0   : > { %1978 = vmatpush3.bf16.msra.mxu0 %v3157_v20  ;;  %v1377_v25 = vsel %vm476_vm6, %v1363_v58, %v1365_v10  ;;  %v1376_v20 = vsel %vm476_vm6, %v1361_v19, %v1363_v58  ;;  %v1473_v8 = vrot.slane %v1458_v40, %v2923_v52 }
 0x3b1   : > { %1979 = vmatprep.subr.bf16.mxu0 %v1359_v60  ;;  %v2314_v60 = vmov 1983009808  }
 0x3b2   : > { %1557 = vmatpush1.bf16.msra.mxu1 %v1372_v6  ;;  %v1395_v9 = vpop.permute.xlu1 %1394  ;;  %v1739_v51 = vunpack.c.l.s4 %v2314_v60 }
 0x3b3   : > { %v1369_v21 = vpop.permute.xlu0 %1368  ;;  %1558 = vmatprep.subr.bf16.mxu1 %v1375_v16 }
 0x3b4   : > { %1980 = vmatpush3.bf16.msra.mxu0 %v3144_v11  ;;  %v1481_v11 = vcombine.high %v3176_v23, %v3176_v23  ;;  %v1740_v2 = vunpack.c.0.s8 %v1739_v51 }
 0x3b5   : > { %1981 = vmatprep.subr.bf16.mxu0 %v1365_v10 }
 0x3b6   : > { %1559 = vmatpush1.bf16.msra.mxu1 %v1374_v14  ;;  %v1393_v38 = vpop.permute.xlu1 %1392  ;;  %v1743_v49 = vsub.s32 %v1740_v2, %v2685_v4 }
 0x3b7   : > { %v1367_v26 = vpop.permute.xlu0 %1366  ;;  %1560 = vmatprep.subr.bf16.mxu1 %v1377_v25  ;;  %v1416_v36 = vsel %vm499_vm7, %v1393_v38, %v1395_v9 }
 0x3b8   : > { %1982 = vmatpush3.bf16.msra.mxu0 %v3185_v31  ;;  %v1378_v56 = vsel %vm476_vm6, %v1367_v26, %v1369_v21 }
 0x3ba   : > { %1561 = vmatpush1.bf16.msra.mxu1 %v1376_v20  ;;  %v1371_v29 = vpop.permute.xlu1 %1370 }
 0x3bb   : > { %v1397_v1 = vpop.permute.xlu0 %1396  ;;  %1983 = vmatprep.subr.bf16.mxu0 %v1371_v29  ;;  %v1379_v54 = vsel %vm476_vm6, %v1369_v21, %v1371_v29 }
 0x3bc   : > { %1562 = vmatprep.subr.bf16.mxu1 %v1379_v54  ;;  %1984 = vmatpush3.bf16.msra.mxu0 %v1283_v46  ;;  %v1417_v31 = vsel %vm499_vm7, %v1395_v9, %v1397_v1 }
 0x3bd   : > { %2008 = vmatprep.subr.bf16.mxu0 %v2312_v35 }
 0x3be   : > { %1563 = vmatpush1.bf16.msra.mxu1 %v1378_v56  ;;  %v1403_v12 = vpop.permute.xlu1 %1402 }
 0x3bf   : > { %v1401_v30 = vpop.permute.xlu0 %1400  ;;  %1573 = vmatprep.subr.bf16.mxu1 %v1417_v31  ;;  %1687 = vmatmul.mubr.bf16.vlgmr.msra.gmra.mrb[20].mxu0 %v1481_v11 }
 0x3c0   : > { %2009 = vmatpush3.bf16.msra.mxu0 %v1397_v1  ;;  %2016 = vmatprep.mubr.msk.bf16.mxu0 %vm2313_vm12, %v2312_v35  ;;  %v1419_v13 = vsel %vm499_vm7, %v1401_v30, %v1403_v12 }
 0x3c1   : > { %1565 = vmatmul.mubr.bf16.vlgmr.msra.gmra.mrb[24].mxu1 %v1481_v11  ;;  %2010 = vmatprep.subr.bf16.mxu0 %v2312_v35 }
 0x3c2   : > { %1574 = vmatpush1.bf16.msra.mxu1 %v1416_v36  ;;  %v1407_v23 = vpop.permute.xlu1 %1406  ;;  %1605 = vmatprep.mubr.bf16.mxu1 %v2309_v7 }
 0x3c3   : > { %v1399_v27 = vpop.permute.xlu0 %1398  ;;  %1575 = vmatprep.subr.bf16.mxu1 %v1419_v13 }
 0x3c4   : > { %v1418_v28 = vsel %vm499_vm7, %v1399_v27, %v1401_v30  ;;  %2011 = vmatpush3.bf16.msra.mxu0 %v1403_v12 }
 0x3c5   : > { %2012 = vmatprep.subr.bf16.mxu0 %v2312_v35 }
 0x3c6   : > { %1576 = vmatpush1.bf16.msra.mxu1 %v1418_v28  ;;  %v1405_v34 = vpop.permute.xlu1 %1404 }
 0x3c7   : > { %v1409_v32 = vpop.permute.xlu0 %1408  ;;  %v1420_v45 = vsel %vm499_vm7, %v1405_v34, %v1407_v23 }
 0x3c8   : > { %2013 = vmatpush3.bf16.msra.mxu0 %v1409_v32  ;;  %v1421_v43 = vsel %vm499_vm7, %v1407_v23, %v1409_v32 }
 0x3c9   : > { %1577 = vmatprep.subr.bf16.mxu1 %v1421_v43  ;;  %2014 = vmatprep.subr.bf16.mxu0 %v2312_v35 }
 0x3ca   : > { %1578 = vmatpush1.bf16.msra.mxu1 %v1420_v45  ;;  %v1415_v7 = vpop.permute.xlu1 %1414 }
 0x3cb   : > { %v1413_v53 = vpop.permute.xlu0 %1412 }
 0x3cc   : > { %2015 = vmatpush3.bf16.msra.mxu0 %v1415_v7  ;;  %v1423_v15 = vsel %vm499_vm7, %v1413_v53, %v1415_v7 }
 0x3cd   : > { %1579 = vmatprep.subr.bf16.mxu1 %v1423_v15 }
 0x3cf   : > { %v1411_v33 = vpop.permute.xlu0 %1410  ;;  %2017 = vmatmul.mubr.msk.bf16.vlgmr.msra.gmra.mrb[24].mxu0 %vm1487_vm13, %v1473_v8 }
 0x3d0   : > { %v1422_v37 = vsel %vm499_vm7, %v1411_v33, %v1413_v53 }
 0x3d1   : > { %1580 = vmatpush1.bf16.msra.mxu1 %v1422_v37 }
 0x3d4   : > { %1896 = vmatmul.mubr.msk.bf16.vlgmr.msra.gmra.mrb[24].mxu1 %vm1487_vm13, %v1473_v8 }
 0x3db   : > { %v1441_v41 = vpop.permute.xlu1 %1440 }
 0x452   : > { %v1963_v42 = vpop.f32.mrb[16].mxu0 }
 0x453   : > { %v1964_v48 = vpop.f32.mrb[17].mxu0 }
 0x454   : > { %v1965_v44 = vadd.f32 %v1964_v48, %v1963_v42  ;;  %v1966_v24 = vpop.f32.mrb[18].mxu0 }
 0x455   : > { %v1967_v46 = vpop.f32.mrb[19].mxu0 }
 0x456   : > { %v1649_v22 = vadd.f32 %v1965_v44, %v1441_v41 }
 0x492   : > { %v1985_v50 = vpop.f32.mrb[20].mxu0 }
 0x493   : > { %v1986_v52 = vpop.f32.mrb[21].mxu0 }
 0x494   : > { %v1987_v55 = vadd.f32 %v1986_v52, %v1985_v50  ;;  %v1988_v47 = vpop.f32.mrb[22].mxu0 }
 0x495   : > { %v1989_v57 = vpop.f32.mrb[23].mxu0 }
 0x496   : > { %v1689_v59 = vadd.f32 %v1987_v55, %v1649_v22 }
 0x4a2   : > { %v1728_v61 = vpop.f32.mrb[24].mxu0 }
 0x4a3   : > { %v1729_v63 = vadd.f32 %v1728_v61, %v1689_v59  ;;  %v2018_v58 = vpop.f32.mrb[25].mxu0 }
 0x4a4   : > { %v1731_v0 = vpop.f32.mrb[26].mxu0 }
 0x4a5   : > { %v2019_v3 = vpop.f32.mrb[27].mxu0  ;;  %v1751_v9 = vrot.slane %v1729_v63, %v1743_v49 }
 0x4a7   : > { %v1607_v5 = vpop.f32.mrb[24].mxu1 }
 0x4a8   : > { %v2036_v18 = vadd.f32 %v1607_v5, %v1441_v41  ;;  %v1609_v17 = vpop.f32.mrb[25].mxu1 }
 0x4a9   : > { %v2037_v19 = vadd.f32 %v1609_v17, %v1441_v41  ;;  %v1611_v62 = vpop.f32.mrb[26].mxu1 }
 0x4aa   : > { %v1612_v10 = vpop.f32.mrb[27].mxu1 }
 0x4ab   : > { %v1737_v6 = vcombine.low %v2036_v18, %v2037_v19 }
 0x4ad   : > { %v1744_v16 = vrot.slane %v1737_v6, %v1743_v49 }
 0x4af   : > { %v1752_v21 = vcombine.low %v1744_v16, %v1751_v9 }
 0x4b1   : > { %1759 = vst.msk [vmem:[%s284_s18] sm:$0x3f] %vm1758_vm2, %v1752_v21 }
 0x4b2   : > { %2238 = shalt.err (!%p2235_p7)
}
 0x4b3   : > { %s2239_s15 = scalar_lea.hbm %s3264_s26, 96  ;;  %s2243_s19 = scalar_lea.hbm %s3314_s6, 192 }
 0x4b4   : > { %p2240_p9 = scmp.ne.s32.totalorder %s3264_s26, %s2239_s15  ;;  %p2244_p5 = scmp.lt.u32.totalorder %s3264_s26, %s3314_s6 }
 0x4b5   : > { %p2245_p2 = scmp.lt.u32.totalorder %s2243_s19, %s2239_s15  ;;  %p2247_p4 = scmp.lt.u32.totalorder %s2239_s15, %s3264_s26 }
 0x4b6   : > { %p2241_p1 = pnand %p2240_p9, %p2445_p12 }
 0x4b7   : > { %p2246_p13 = por %p2245_p2, %p2244_p5 }
 0x4b8   : > { %p2242_p0 = pneg %p2241_p1 }
 0x4b9   : > { %p2248_p6 = por %p2247_p4, %p2246_p13 }
 0x4bb   : > { %p2249_p8 = pnand %p2248_p6, %p2242_p0 }
 0x4bd   : > { %2252 = shalt.err (!%p2249_p8)
}
 0x4be   : > { %2073 = dma.vmem_to_hbm [thread:$0]  (%p2445_p12), %s3266_s11, 96, %s3264_s26, %s1761_s12  }
 0x4bf PF: > { %s1787_s18 = sand.u32 1, %s2283_s21   ;;  %p3341_p10 = scmp.ne.s32.totalorder %s3325_s28, 0 }
 0x4c0   : > { %p3342_p11 = scmp.ge.s32.totalorder %s2295_s24, 2  ;;  %s1788_s8 = scalar_lea.sflag [#allocation4], %s1787_s18 }
 0x4c2   : > { %p2084_p3 = pnand %p3342_p11, %p3341_p10 }
 0x4c4   : > { %2278 = dma.done.wait (!%p2084_p3), %s1788_s8, 96  }
 0x4c5   : > { %2280 = vsyncadd (!%p2084_p3), %s1788_s8, 4294967200  ;;  %p20_p7 = scmp.ge.s32.totalorder %s2407_s9, 4   ;;  %s3343_s21 = smov %s2287_s22 }
 0x4c6   : > { %s3344_s22 = smov %s2291_s23  ;;  %s3345_s23 = smov %s2441_s13 }
 0x4c7   : > { %s3346_s24 = smov %s2407_s9  ;;  %22 = sbr.rel (!%p20_p7) target bundleno = 6 (0x6), region = 93 }
 0x4ce   :  { %1793 = vsyncpa [#allocation3], 1 }
 0x4cf   :  { %1795 = vsyncpa [#allocation3 + $0x1], 1 }
 0x4d0   :  { %1796 = vsyncpa [#allocation6], 1 }
 0x4d1   :  { %1797 = vsyncpa [#allocation4], 1 }
 0x4d2   :  { %1799 = vsyncpa [#allocation4 + $0x1], 1 }

</bundles_post_ra>
